<compile_context>
chip_gen: v7x
topology: tpu7x:2x2x1
jax: 0.10.0
libtpu: 0.0.40
codegen_flags: <defaults>
</compile_context>

<pallas_src>
import functools

import jax
import jax.numpy as jnp
from jax.experimental import pallas as pl
from jax.experimental.pallas import tpu as pltpu


def _convbnr_kernel(x_ref, w_ref, bias_ref, o_ref, col_ref, y_ref, *,
                    n_imgs, c_in, wp, l_dense, ho1, wo1, kh_taps, kw_taps,
                    dilation):
    """Fused conv + folded-BN + ReLU, whole batch in one invocation.

    x_ref:    (N, Cin, Lf)        zero-padded input, H/W flattened (row pitch = Wp)
    w_ref:    (Cout, KH*KW*Cin)   conv weights with BN scale folded in (im2col order)
    bias_ref: (Cout, 1)           folded BN bias
    o_ref:    (N, Cout, Ho1*Wo1)  stride-1 ("dense") output, lane-dense
    col_ref:  (KH*KW*Cin, N*L)    VMEM scratch: shifted-row im2col matrix
    y_ref:    (Cout, N*L)         VMEM scratch: dense conv result
    """
    # 1) Build the im2col matrix with contiguous shifted slices: in the
    #    flattened (row pitch Wp) input, tap (kh, kw) is a constant offset.
    for kh in range(kh_taps):
        for kw in range(kw_taps):
            tap = kh * kw_taps + kw
            off = (kh * wp + kw) * dilation
            for n in range(n_imgs):
                col_ref[tap * c_in:(tap + 1) * c_in,
                        n * l_dense:(n + 1) * l_dense] = (
                    x_ref[n, :, off:off + l_dense].astype(col_ref.dtype))

    # 2) One MXU matmul over the folded K = KH*KW*Cin axis (batch folded into N).
    acc = jnp.dot(w_ref[...], col_ref[...],
                  preferred_element_type=jnp.float32)          # (Cout, N*L)

    # 3) Folded-BN bias + ReLU epilogue (BN scale already folded into weights).
    y_ref[...] = jnp.maximum(acc + bias_ref[...], 0.0)

    # 4) Each dense row (pitch Wp) carries Wo1 valid outputs; copy them into
    #    the lane-dense (Cout, Ho1*Wo1) output block.
    for n in range(n_imgs):
        for ho in range(ho1):
            src = n * l_dense + ho * wp
            o_ref[n, :, ho * wo1:(ho + 1) * wo1] = (
                y_ref[:, src:src + wo1].astype(o_ref.dtype))


def conv_bnr(x_nchw, weight_oihw, gamma, beta, running_mean, running_var,
             *, stride=1, dilation=1, eps=1e-5):
    """Pallas ConvBNR forward (eval-mode BN).  NCHW in / NCHW out."""
    N, Cin, H, W = x_nchw.shape
    Cout, _, KH, KW = weight_oihw.shape
    pad = dilation                        # padding=dilation in the PyTorch module

    Hp, Wp = H + 2 * pad, W + 2 * pad
    # Stride-1 ("dense") output extent; the strided output is a subsample of it.
    Ho1 = H + 2 * pad - dilation * (KH - 1)
    Wo1 = W + 2 * pad - dilation * (KW - 1)
    L = Ho1 * Wp                          # dense-grid columns per image

    # A spare zero row so every tap's contiguous slice stays in bounds.
    kw_reach = (KW - 1) * dilation
    extra_rows = -(-kw_reach // Wp) if kw_reach > 0 else 0
    # Zero-pad once in HBM and flatten H,W (the flatten itself is free).
    # TODO(synk): fold the spatial padding into the kernel to save this HBM pass.
    x_pad = jnp.pad(x_nchw, ((0, 0), (0, 0), (pad, pad + extra_rows), (pad, pad)))
    Lf = (Hp + extra_rows) * Wp
    x_flat = x_pad.reshape(N, Cin, Lf)

    # Fold eval-mode BatchNorm into the conv weights (scale) and a bias.
    scale = (gamma / jnp.sqrt(running_var + eps)).astype(jnp.float32)
    bias = (beta - running_mean * scale).astype(jnp.float32)
    # Weights -> (Cout, KH*KW*Cin) in (kh, kw, cin) im2col order, scale folded in.
    # TODO(synk): for large non-toy shapes cast weights/activations to bf16 here
    # (keeping the f32 accumulator) to reach v6e/v7x MXU peak.
    w2d = (jnp.transpose(weight_oihw, (0, 2, 3, 1))
           .reshape(Cout, KH * KW * Cin) * scale[:, None]).astype(jnp.float32)
    bias2d = bias.reshape(Cout, 1)

    kernel = functools.partial(
        _convbnr_kernel, n_imgs=N, c_in=Cin, wp=Wp, l_dense=L,
        ho1=Ho1, wo1=Wo1, kh_taps=KH, kw_taps=KW, dilation=dilation)

    flops = 2 * N * Ho1 * Wo1 * KH * KW * Cin * Cout
    bytes_accessed = 4 * (x_flat.size + w2d.size + bias2d.size
                          + N * Cout * Ho1 * Wo1)

    out_flat = pl.pallas_call(
        kernel,
        out_shape=jax.ShapeDtypeStruct((N, Cout, Ho1 * Wo1), x_nchw.dtype),
        grid_spec=pltpu.PrefetchScalarGridSpec(
            num_scalar_prefetch=0,
            grid=(1,),
            in_specs=[
                pl.BlockSpec((N, Cin, Lf), lambda i: (0, 0, 0)),
                pl.BlockSpec((Cout, KH * KW * Cin), lambda i: (0, 0)),
                pl.BlockSpec((Cout, 1), lambda i: (0, 0)),
            ],
            out_specs=pl.BlockSpec((N, Cout, Ho1 * Wo1), lambda i: (0, 0, 0)),
            scratch_shapes=[
                pltpu.VMEM((KH * KW * Cin, N * L), jnp.float32),
                pltpu.VMEM((Cout, N * L), jnp.float32),
            ],
        ),
        compiler_params=pltpu.CompilerParams(
            dimension_semantics=("arbitrary",)),
        cost_estimate=pl.CostEstimate(flops=flops, transcendentals=0,
                                      bytes_accessed=bytes_accessed),
    )(x_flat, w2d, bias2d)

    # Free (contiguous) reshape back to NCHW; no transpose pass.
    out = out_flat.reshape(N, Cout, Ho1, Wo1)
    if stride > 1:
        # TODO(synk): stride>1 recomputes the dense conv and subsamples; fine
        # for this module (stride defaults to 1 everywhere it is used).
        out = out[:, :, ::stride, ::stride]
    return out


def _reference(x_nchw, weight_oihw, gamma, beta, running_mean, running_var,
               *, stride=1, dilation=1, eps=1e-5):
    """Pure-JAX reference (lax conv) for correctness check."""
    pad = dilation
    y = jax.lax.conv_general_dilated(
        x_nchw.astype(jnp.float32), weight_oihw.astype(jnp.float32),
        window_strides=(stride, stride),
        padding=((pad, pad), (pad, pad)),
        rhs_dilation=(dilation, dilation),
        dimension_numbers=("NCHW", "OIHW", "NCHW"))
    scale = gamma / jnp.sqrt(running_var + eps)
    bias = beta - running_mean * scale
    y = y * scale[None, :, None, None] + bias[None, :, None, None]
    return jnp.maximum(y, 0.0)


if __name__ == "__main__":
    # Module config: ConvBNR(inplanes=4, planes=8, kernel_size=3)
    N, Cin, H, W = 2, 4, 16, 16
    Cout, KH, KW = 8, 3, 3

    key = jax.random.PRNGKey(0)
    k_x, k_w, k_g, k_b, k_m, k_v = jax.random.split(key, 6)

    x = jax.random.normal(k_x, (N, Cin, H, W), jnp.float32)
    weight = jax.random.normal(k_w, (Cout, Cin, KH, KW), jnp.float32) * 0.1
    gamma = jax.random.normal(k_g, (Cout,), jnp.float32) * 0.1 + 1.0
    beta = jax.random.normal(k_b, (Cout,), jnp.float32) * 0.1
    running_mean = jax.random.normal(k_m, (Cout,), jnp.float32) * 0.1
    running_var = jnp.abs(jax.random.normal(k_v, (Cout,), jnp.float32)) * 0.1 + 1.0

    for (stride, dilation) in [(1, 1), (2, 2)]:
        out = conv_bnr(x, weight, gamma, beta, running_mean, running_var,
                       stride=stride, dilation=dilation)
        out = jax.block_until_ready(out)
        ref = _reference(x, weight, gamma, beta, running_mean, running_var,
                         stride=stride, dilation=dilation)
        assert out.shape == ref.shape, (out.shape, ref.shape)
        max_err = float(jnp.max(jnp.abs(out - ref)))
        assert jnp.allclose(out, ref, atol=1e-4, rtol=1e-4), (stride, dilation, max_err)

    print("KERNEL_OK")
</pallas_src>

<mosaic_0001>
module attributes {stable_mosaic.version = 11 : i64} {
  func.func @_convbnr_kernel(%arg0: i32, %arg1: memref<2x4x342xf32, #tpu.memory_space<vmem>>, %arg2: memref<8x36xf32, #tpu.memory_space<vmem>>, %arg3: memref<8x1xf32, #tpu.memory_space<vmem>>, %arg4: memref<2x8x256xf32, #tpu.memory_space<vmem>>, %arg5: memref<36x576xf32, #tpu.memory_space<vmem>>, %arg6: memref<8x576xf32, #tpu.memory_space<vmem>>) attributes {dimension_semantics = [#tpu.dimension_semantics<arbitrary>], iteration_bounds = array<i64: 1>, scalar_prefetch = 0 : i64, scratch_operands = 2 : i64, tpu.core_type = #tpu.core_type<tc>, window_params = [{pipeline_mode = #tpu.pipeline_mode<synchronous>, transform_indices = @transform_0, window_bounds = array<i64: 2, 4, 342>}, {pipeline_mode = #tpu.pipeline_mode<synchronous>, transform_indices = @transform_1, window_bounds = array<i64: 8, 36>}, {pipeline_mode = #tpu.pipeline_mode<synchronous>, transform_indices = @transform_2, window_bounds = array<i64: 8, 1>}, {pipeline_mode = #tpu.pipeline_mode<synchronous>, transform_indices = @transform_3, window_bounds = array<i64: 2, 8, 256>}]} {
    %c0 = arith.constant 0 : index
    %c0_0 = arith.constant 0 : index
    %c0_1 = arith.constant 0 : index
    %0 = vector.load %arg1[%c0, %c0_0, %c0_1] : memref<2x4x342xf32, #tpu.memory_space<vmem>>, vector<1x4x288xf32>
    %1 = vector.shape_cast %0 : vector<1x4x288xf32> to vector<4x288xf32>
    %c0_2 = arith.constant 0 : index
    %c0_3 = arith.constant 0 : index
    %2 = vector.load %arg5[%c0_2, %c0_3] : memref<36x576xf32, #tpu.memory_space<vmem>>, vector<4x288xf32>
    tpu.vector_store %arg5[%c0_2, %c0_3], %1 {strides = array<i32>} : memref<36x576xf32, #tpu.memory_space<vmem>>, vector<4x288xf32>,
    %c1 = arith.constant 1 : index
    %c0_4 = arith.constant 0 : index
    %c0_5 = arith.constant 0 : index
    %3 = vector.load %arg1[%c1, %c0_4, %c0_5] : memref<2x4x342xf32, #tpu.memory_space<vmem>>, vector<1x4x288xf32>
    %4 = vector.shape_cast %3 : vector<1x4x288xf32> to vector<4x288xf32>
    %c0_6 = arith.constant 0 : index
    %c288 = arith.constant 288 : index
    %5 = vector.load %arg5[%c0_6, %c288] : memref<36x576xf32, #tpu.memory_space<vmem>>, vector<4x288xf32>
    tpu.vector_store %arg5[%c0_6, %c288], %4 {strides = array<i32>} : memref<36x576xf32, #tpu.memory_space<vmem>>, vector<4x288xf32>,
    %c0_7 = arith.constant 0 : index
    %c0_8 = arith.constant 0 : index
    %c1_9 = arith.constant 1 : index
    %6 = vector.load %arg1[%c0_7, %c0_8, %c1_9] : memref<2x4x342xf32, #tpu.memory_space<vmem>>, vector<1x4x288xf32>
    %7 = vector.shape_cast %6 : vector<1x4x288xf32> to vector<4x288xf32>
    %c4 = arith.constant 4 : index
    %c0_10 = arith.constant 0 : index
    %8 = vector.load %arg5[%c4, %c0_10] : memref<36x576xf32, #tpu.memory_space<vmem>>, vector<4x288xf32>
    tpu.vector_store %arg5[%c4, %c0_10], %7 {strides = array<i32>} : memref<36x576xf32, #tpu.memory_space<vmem>>, vector<4x288xf32>,
    %c1_11 = arith.constant 1 : index
    %c0_12 = arith.constant 0 : index
    %c1_13 = arith.constant 1 : index
    %9 = vector.load %arg1[%c1_11, %c0_12, %c1_13] : memref<2x4x342xf32, #tpu.memory_space<vmem>>, vector<1x4x288xf32>
    %10 = vector.shape_cast %9 : vector<1x4x288xf32> to vector<4x288xf32>
    %c4_14 = arith.constant 4 : index
    %c288_15 = arith.constant 288 : index
    %11 = vector.load %arg5[%c4_14, %c288_15] : memref<36x576xf32, #tpu.memory_space<vmem>>, vector<4x288xf32>
    tpu.vector_store %arg5[%c4_14, %c288_15], %10 {strides = array<i32>} : memref<36x576xf32, #tpu.memory_space<vmem>>, vector<4x288xf32>,
    %c0_16 = arith.constant 0 : index
    %c0_17 = arith.constant 0 : index
    %c2 = arith.constant 2 : index
    %12 = vector.load %arg1[%c0_16, %c0_17, %c2] : memref<2x4x342xf32, #tpu.memory_space<vmem>>, vector<1x4x288xf32>
    %13 = vector.shape_cast %12 : vector<1x4x288xf32> to vector<4x288xf32>
    %c8 = arith.constant 8 : index
    %c0_18 = arith.constant 0 : index
    %14 = vector.load %arg5[%c8, %c0_18] : memref<36x576xf32, #tpu.memory_space<vmem>>, vector<4x288xf32>
    tpu.vector_store %arg5[%c8, %c0_18], %13 {strides = array<i32>} : memref<36x576xf32, #tpu.memory_space<vmem>>, vector<4x288xf32>,
    %c1_19 = arith.constant 1 : index
    %c0_20 = arith.constant 0 : index
    %c2_21 = arith.constant 2 : index
    %15 = vector.load %arg1[%c1_19, %c0_20, %c2_21] : memref<2x4x342xf32, #tpu.memory_space<vmem>>, vector<1x4x288xf32>
    %16 = vector.shape_cast %15 : vector<1x4x288xf32> to vector<4x288xf32>
    %c8_22 = arith.constant 8 : index
    %c288_23 = arith.constant 288 : index
    %17 = vector.load %arg5[%c8_22, %c288_23] : memref<36x576xf32, #tpu.memory_space<vmem>>, vector<4x288xf32>
    tpu.vector_store %arg5[%c8_22, %c288_23], %16 {strides = array<i32>} : memref<36x576xf32, #tpu.memory_space<vmem>>, vector<4x288xf32>,
    %c0_24 = arith.constant 0 : index
    %c0_25 = arith.constant 0 : index
    %c18 = arith.constant 18 : index
    %18 = vector.load %arg1[%c0_24, %c0_25, %c18] : memref<2x4x342xf32, #tpu.memory_space<vmem>>, vector<1x4x288xf32>
    %19 = vector.shape_cast %18 : vector<1x4x288xf32> to vector<4x288xf32>
    %c12 = arith.constant 12 : index
    %c0_26 = arith.constant 0 : index
    %20 = vector.load %arg5[%c12, %c0_26] : memref<36x576xf32, #tpu.memory_space<vmem>>, vector<4x288xf32>
    tpu.vector_store %arg5[%c12, %c0_26], %19 {strides = array<i32>} : memref<36x576xf32, #tpu.memory_space<vmem>>, vector<4x288xf32>,
    %c1_27 = arith.constant 1 : index
    %c0_28 = arith.constant 0 : index
    %c18_29 = arith.constant 18 : index
    %21 = vector.load %arg1[%c1_27, %c0_28, %c18_29] : memref<2x4x342xf32, #tpu.memory_space<vmem>>, vector<1x4x288xf32>
    %22 = vector.shape_cast %21 : vector<1x4x288xf32> to vector<4x288xf32>
    %c12_30 = arith.constant 12 : index
    %c288_31 = arith.constant 288 : index
    %23 = vector.load %arg5[%c12_30, %c288_31] : memref<36x576xf32, #tpu.memory_space<vmem>>, vector<4x288xf32>
    tpu.vector_store %arg5[%c12_30, %c288_31], %22 {strides = array<i32>} : memref<36x576xf32, #tpu.memory_space<vmem>>, vector<4x288xf32>,
    %c0_32 = arith.constant 0 : index
    %c0_33 = arith.constant 0 : index
    %c19 = arith.constant 19 : index
    %24 = vector.load %arg1[%c0_32, %c0_33, %c19] : memref<2x4x342xf32, #tpu.memory_space<vmem>>, vector<1x4x288xf32>
    %25 = vector.shape_cast %24 : vector<1x4x288xf32> to vector<4x288xf32>
    %c16 = arith.constant 16 : index
    %c0_34 = arith.constant 0 : index
    %26 = vector.load %arg5[%c16, %c0_34] : memref<36x576xf32, #tpu.memory_space<vmem>>, vector<4x288xf32>
    tpu.vector_store %arg5[%c16, %c0_34], %25 {strides = array<i32>} : memref<36x576xf32, #tpu.memory_space<vmem>>, vector<4x288xf32>,
    %c1_35 = arith.constant 1 : index
    %c0_36 = arith.constant 0 : index
    %c19_37 = arith.constant 19 : index
    %27 = vector.load %arg1[%c1_35, %c0_36, %c19_37] : memref<2x4x342xf32, #tpu.memory_space<vmem>>, vector<1x4x288xf32>
    %28 = vector.shape_cast %27 : vector<1x4x288xf32> to vector<4x288xf32>
    %c16_38 = arith.constant 16 : index
    %c288_39 = arith.constant 288 : index
    %29 = vector.load %arg5[%c16_38, %c288_39] : memref<36x576xf32, #tpu.memory_space<vmem>>, vector<4x288xf32>
    tpu.vector_store %arg5[%c16_38, %c288_39], %28 {strides = array<i32>} : memref<36x576xf32, #tpu.memory_space<vmem>>, vector<4x288xf32>,
    %c0_40 = arith.constant 0 : index
    %c0_41 = arith.constant 0 : index
    %c20 = arith.constant 20 : index
    %30 = vector.load %arg1[%c0_40, %c0_41, %c20] : memref<2x4x342xf32, #tpu.memory_space<vmem>>, vector<1x4x288xf32>
    %31 = vector.shape_cast %30 : vector<1x4x288xf32> to vector<4x288xf32>
    %c20_42 = arith.constant 20 : index
    %c0_43 = arith.constant 0 : index
    %32 = vector.load %arg5[%c20_42, %c0_43] : memref<36x576xf32, #tpu.memory_space<vmem>>, vector<4x288xf32>
    tpu.vector_store %arg5[%c20_42, %c0_43], %31 {strides = array<i32>} : memref<36x576xf32, #tpu.memory_space<vmem>>, vector<4x288xf32>,
    %c1_44 = arith.constant 1 : index
    %c0_45 = arith.constant 0 : index
    %c20_46 = arith.constant 20 : index
    %33 = vector.load %arg1[%c1_44, %c0_45, %c20_46] : memref<2x4x342xf32, #tpu.memory_space<vmem>>, vector<1x4x288xf32>
    %34 = vector.shape_cast %33 : vector<1x4x288xf32> to vector<4x288xf32>
    %c20_47 = arith.constant 20 : index
    %c288_48 = arith.constant 288 : index
    %35 = vector.load %arg5[%c20_47, %c288_48] : memref<36x576xf32, #tpu.memory_space<vmem>>, vector<4x288xf32>
    tpu.vector_store %arg5[%c20_47, %c288_48], %34 {strides = array<i32>} : memref<36x576xf32, #tpu.memory_space<vmem>>, vector<4x288xf32>,
    %c0_49 = arith.constant 0 : index
    %c0_50 = arith.constant 0 : index
    %c36 = arith.constant 36 : index
    %36 = vector.load %arg1[%c0_49, %c0_50, %c36] : memref<2x4x342xf32, #tpu.memory_space<vmem>>, vector<1x4x288xf32>
    %37 = vector.shape_cast %36 : vector<1x4x288xf32> to vector<4x288xf32>
    %c24 = arith.constant 24 : index
    %c0_51 = arith.constant 0 : index
    %38 = vector.load %arg5[%c24, %c0_51] : memref<36x576xf32, #tpu.memory_space<vmem>>, vector<4x288xf32>
    tpu.vector_store %arg5[%c24, %c0_51], %37 {strides = array<i32>} : memref<36x576xf32, #tpu.memory_space<vmem>>, vector<4x288xf32>,
    %c1_52 = arith.constant 1 : index
    %c0_53 = arith.constant 0 : index
    %c36_54 = arith.constant 36 : index
    %39 = vector.load %arg1[%c1_52, %c0_53, %c36_54] : memref<2x4x342xf32, #tpu.memory_space<vmem>>, vector<1x4x288xf32>
    %40 = vector.shape_cast %39 : vector<1x4x288xf32> to vector<4x288xf32>
    %c24_55 = arith.constant 24 : index
    %c288_56 = arith.constant 288 : index
    %41 = vector.load %arg5[%c24_55, %c288_56] : memref<36x576xf32, #tpu.memory_space<vmem>>, vector<4x288xf32>
    tpu.vector_store %arg5[%c24_55, %c288_56], %40 {strides = array<i32>} : memref<36x576xf32, #tpu.memory_space<vmem>>, vector<4x288xf32>,
    %c0_57 = arith.constant 0 : index
    %c0_58 = arith.constant 0 : index
    %c37 = arith.constant 37 : index
    %42 = vector.load %arg1[%c0_57, %c0_58, %c37] : memref<2x4x342xf32, #tpu.memory_space<vmem>>, vector<1x4x288xf32>
    %43 = vector.shape_cast %42 : vector<1x4x288xf32> to vector<4x288xf32>
    %c28 = arith.constant 28 : index
    %c0_59 = arith.constant 0 : index
    %44 = vector.load %arg5[%c28, %c0_59] : memref<36x576xf32, #tpu.memory_space<vmem>>, vector<4x288xf32>
    tpu.vector_store %arg5[%c28, %c0_59], %43 {strides = array<i32>} : memref<36x576xf32, #tpu.memory_space<vmem>>, vector<4x288xf32>,
    %c1_60 = arith.constant 1 : index
    %c0_61 = arith.constant 0 : index
    %c37_62 = arith.constant 37 : index
    %45 = vector.load %arg1[%c1_60, %c0_61, %c37_62] : memref<2x4x342xf32, #tpu.memory_space<vmem>>, vector<1x4x288xf32>
    %46 = vector.shape_cast %45 : vector<1x4x288xf32> to vector<4x288xf32>
    %c28_63 = arith.constant 28 : index
    %c288_64 = arith.constant 288 : index
    %47 = vector.load %arg5[%c28_63, %c288_64] : memref<36x576xf32, #tpu.memory_space<vmem>>, vector<4x288xf32>
    tpu.vector_store %arg5[%c28_63, %c288_64], %46 {strides = array<i32>} : memref<36x576xf32, #tpu.memory_space<vmem>>, vector<4x288xf32>,
    %c0_65 = arith.constant 0 : index
    %c0_66 = arith.constant 0 : index
    %c38 = arith.constant 38 : index
    %48 = vector.load %arg1[%c0_65, %c0_66, %c38] : memref<2x4x342xf32, #tpu.memory_space<vmem>>, vector<1x4x288xf32>
    %49 = vector.shape_cast %48 : vector<1x4x288xf32> to vector<4x288xf32>
    %c32 = arith.constant 32 : index
    %c0_67 = arith.constant 0 : index
    %50 = vector.load %arg5[%c32, %c0_67] : memref<36x576xf32, #tpu.memory_space<vmem>>, vector<4x288xf32>
    tpu.vector_store %arg5[%c32, %c0_67], %49 {strides = array<i32>} : memref<36x576xf32, #tpu.memory_space<vmem>>, vector<4x288xf32>,
    %c1_68 = arith.constant 1 : index
    %c0_69 = arith.constant 0 : index
    %c38_70 = arith.constant 38 : index
    %51 = vector.load %arg1[%c1_68, %c0_69, %c38_70] : memref<2x4x342xf32, #tpu.memory_space<vmem>>, vector<1x4x288xf32>
    %52 = vector.shape_cast %51 : vector<1x4x288xf32> to vector<4x288xf32>
    %c32_71 = arith.constant 32 : index
    %c288_72 = arith.constant 288 : index
    %53 = vector.load %arg5[%c32_71, %c288_72] : memref<36x576xf32, #tpu.memory_space<vmem>>, vector<4x288xf32>
    tpu.vector_store %arg5[%c32_71, %c288_72], %52 {strides = array<i32>} : memref<36x576xf32, #tpu.memory_space<vmem>>, vector<4x288xf32>,
    %c0_73 = arith.constant 0 : index
    %c0_74 = arith.constant 0 : index
    %54 = vector.load %arg2[%c0_73, %c0_74] : memref<8x36xf32, #tpu.memory_space<vmem>>, vector<8x36xf32>
    %c0_75 = arith.constant 0 : index
    %c0_76 = arith.constant 0 : index
    %55 = vector.load %arg5[%c0_75, %c0_76] : memref<36x576xf32, #tpu.memory_space<vmem>>, vector<36x576xf32>
    %cst = arith.constant dense<0.000000e+00> : vector<8x576xf32>
    %56 = tpu.matmul %54, %55, %cst {dimension_numbers = #tpu.dot_dimension_numbers<[1], [0], [0], [1], [0, 0, 1, 1], [], []>} : vector<8x36xf32>, vector<36x576xf32>, vector<8x576xf32> -> vector<8x576xf32>
    %c0_77 = arith.constant 0 : index
    %c0_78 = arith.constant 0 : index
    %57 = vector.load %arg3[%c0_77, %c0_78] : memref<8x1xf32, #tpu.memory_space<vmem>>, vector<8x1xf32>
    %58 = vector.broadcast %57 : vector<8x1xf32> to vector<8x576xf32>
    %59 = arith.addf %56, %58 : vector<8x576xf32>
    %cst_79 = arith.constant 0.000000e+00 : f32
    %60 = vector.broadcast %cst_79 : f32 to vector<8x576xf32>
    %61 = arith.maximumf %59, %60 : vector<8x576xf32>
    %c0_80 = arith.constant 0 : index
    %c0_81 = arith.constant 0 : index
    %62 = vector.load %arg6[%c0_80, %c0_81] : memref<8x576xf32, #tpu.memory_space<vmem>>, vector<8x576xf32>
    tpu.vector_store %arg6[%c0_80, %c0_81], %61 {strides = array<i32>} : memref<8x576xf32, #tpu.memory_space<vmem>>, vector<8x576xf32>,
    %c0_82 = arith.constant 0 : index
    %c0_83 = arith.constant 0 : index
    %63 = vector.load %arg6[%c0_82, %c0_83] : memref<8x576xf32, #tpu.memory_space<vmem>>, vector<8x16xf32>
    %c0_84 = arith.constant 0 : index
    %c0_85 = arith.constant 0 : index
    %c0_86 = arith.constant 0 : index
    %64 = vector.load %arg4[%c0_84, %c0_85, %c0_86] : memref<2x8x256xf32, #tpu.memory_space<vmem>>, vector<1x8x16xf32>
    %65 = vector.shape_cast %64 : vector<1x8x16xf32> to vector<8x16xf32>
    %66 = vector.shape_cast %63 : vector<8x16xf32> to vector<1x8x16xf32>
    tpu.vector_store %arg4[%c0_84, %c0_85, %c0_86], %66 {strides = array<i32>} : memref<2x8x256xf32, #tpu.memory_space<vmem>>, vector<1x8x16xf32>,
    %c0_87 = arith.constant 0 : index
    %c18_88 = arith.constant 18 : index
    %67 = vector.load %arg6[%c0_87, %c18_88] : memref<8x576xf32, #tpu.memory_space<vmem>>, vector<8x16xf32>
    %c0_89 = arith.constant 0 : index
    %c0_90 = arith.constant 0 : index
    %c16_91 = arith.constant 16 : index
    %68 = vector.load %arg4[%c0_89, %c0_90, %c16_91] : memref<2x8x256xf32, #tpu.memory_space<vmem>>, vector<1x8x16xf32>
    %69 = vector.shape_cast %68 : vector<1x8x16xf32> to vector<8x16xf32>
    %70 = vector.shape_cast %67 : vector<8x16xf32> to vector<1x8x16xf32>
    tpu.vector_store %arg4[%c0_89, %c0_90, %c16_91], %70 {strides = array<i32>} : memref<2x8x256xf32, #tpu.memory_space<vmem>>, vector<1x8x16xf32>,
    %c0_92 = arith.constant 0 : index
    %c36_93 = arith.constant 36 : index
    %71 = vector.load %arg6[%c0_92, %c36_93] : memref<8x576xf32, #tpu.memory_space<vmem>>, vector<8x16xf32>
    %c0_94 = arith.constant 0 : index
    %c0_95 = arith.constant 0 : index
    %c32_96 = arith.constant 32 : index
    %72 = vector.load %arg4[%c0_94, %c0_95, %c32_96] : memref<2x8x256xf32, #tpu.memory_space<vmem>>, vector<1x8x16xf32>
    %73 = vector.shape_cast %72 : vector<1x8x16xf32> to vector<8x16xf32>
    %74 = vector.shape_cast %71 : vector<8x16xf32> to vector<1x8x16xf32>
    tpu.vector_store %arg4[%c0_94, %c0_95, %c32_96], %74 {strides = array<i32>} : memref<2x8x256xf32, #tpu.memory_space<vmem>>, vector<1x8x16xf32>,
    %c0_97 = arith.constant 0 : index
    %c54 = arith.constant 54 : index
    %75 = vector.load %arg6[%c0_97, %c54] : memref<8x576xf32, #tpu.memory_space<vmem>>, vector<8x16xf32>
    %c0_98 = arith.constant 0 : index
    %c0_99 = arith.constant 0 : index
    %c48 = arith.constant 48 : index
    %76 = vector.load %arg4[%c0_98, %c0_99, %c48] : memref<2x8x256xf32, #tpu.memory_space<vmem>>, vector<1x8x16xf32>
    %77 = vector.shape_cast %76 : vector<1x8x16xf32> to vector<8x16xf32>
    %78 = vector.shape_cast %75 : vector<8x16xf32> to vector<1x8x16xf32>
    tpu.vector_store %arg4[%c0_98, %c0_99, %c48], %78 {strides = array<i32>} : memref<2x8x256xf32, #tpu.memory_space<vmem>>, vector<1x8x16xf32>,
    %c0_100 = arith.constant 0 : index
    %c72 = arith.constant 72 : index
    %79 = vector.load %arg6[%c0_100, %c72] : memref<8x576xf32, #tpu.memory_space<vmem>>, vector<8x16xf32>
    %c0_101 = arith.constant 0 : index
    %c0_102 = arith.constant 0 : index
    %c64 = arith.constant 64 : index
    %80 = vector.load %arg4[%c0_101, %c0_102, %c64] : memref<2x8x256xf32, #tpu.memory_space<vmem>>, vector<1x8x16xf32>
    %81 = vector.shape_cast %80 : vector<1x8x16xf32> to vector<8x16xf32>
    %82 = vector.shape_cast %79 : vector<8x16xf32> to vector<1x8x16xf32>
    tpu.vector_store %arg4[%c0_101, %c0_102, %c64], %82 {strides = array<i32>} : memref<2x8x256xf32, #tpu.memory_space<vmem>>, vector<1x8x16xf32>,
    %c0_103 = arith.constant 0 : index
    %c90 = arith.constant 90 : index
    %83 = vector.load %arg6[%c0_103, %c90] : memref<8x576xf32, #tpu.memory_space<vmem>>, vector<8x16xf32>
    %c0_104 = arith.constant 0 : index
    %c0_105 = arith.constant 0 : index
    %c80 = arith.constant 80 : index
    %84 = vector.load %arg4[%c0_104, %c0_105, %c80] : memref<2x8x256xf32, #tpu.memory_space<vmem>>, vector<1x8x16xf32>
    %85 = vector.shape_cast %84 : vector<1x8x16xf32> to vector<8x16xf32>
    %86 = vector.shape_cast %83 : vector<8x16xf32> to vector<1x8x16xf32>
    tpu.vector_store %arg4[%c0_104, %c0_105, %c80], %86 {strides = array<i32>} : memref<2x8x256xf32, #tpu.memory_space<vmem>>, vector<1x8x16xf32>,
    %c0_106 = arith.constant 0 : index
    %c108 = arith.constant 108 : index
    %87 = vector.load %arg6[%c0_106, %c108] : memref<8x576xf32, #tpu.memory_space<vmem>>, vector<8x16xf32>
    %c0_107 = arith.constant 0 : index
    %c0_108 = arith.constant 0 : index
    %c96 = arith.constant 96 : index
    %88 = vector.load %arg4[%c0_107, %c0_108, %c96] : memref<2x8x256xf32, #tpu.memory_space<vmem>>, vector<1x8x16xf32>
    %89 = vector.shape_cast %88 : vector<1x8x16xf32> to vector<8x16xf32>
    %90 = vector.shape_cast %87 : vector<8x16xf32> to vector<1x8x16xf32>
    tpu.vector_store %arg4[%c0_107, %c0_108, %c96], %90 {strides = array<i32>} : memref<2x8x256xf32, #tpu.memory_space<vmem>>, vector<1x8x16xf32>,
    %c0_109 = arith.constant 0 : index
    %c126 = arith.constant 126 : index
    %91 = vector.load %arg6[%c0_109, %c126] : memref<8x576xf32, #tpu.memory_space<vmem>>, vector<8x16xf32>
    %c0_110 = arith.constant 0 : index
    %c0_111 = arith.constant 0 : index
    %c112 = arith.constant 112 : index
    %92 = vector.load %arg4[%c0_110, %c0_111, %c112] : memref<2x8x256xf32, #tpu.memory_space<vmem>>, vector<1x8x16xf32>
    %93 = vector.shape_cast %92 : vector<1x8x16xf32> to vector<8x16xf32>
    %94 = vector.shape_cast %91 : vector<8x16xf32> to vector<1x8x16xf32>
    tpu.vector_store %arg4[%c0_110, %c0_111, %c112], %94 {strides = array<i32>} : memref<2x8x256xf32, #tpu.memory_space<vmem>>, vector<1x8x16xf32>,
    %c0_112 = arith.constant 0 : index
    %c144 = arith.constant 144 : index
    %95 = vector.load %arg6[%c0_112, %c144] : memref<8x576xf32, #tpu.memory_space<vmem>>, vector<8x16xf32>
    %c0_113 = arith.constant 0 : index
    %c0_114 = arith.constant 0 : index
    %c128 = arith.constant 128 : index
    %96 = vector.load %arg4[%c0_113, %c0_114, %c128] : memref<2x8x256xf32, #tpu.memory_space<vmem>>, vector<1x8x16xf32>
    %97 = vector.shape_cast %96 : vector<1x8x16xf32> to vector<8x16xf32>
    %98 = vector.shape_cast %95 : vector<8x16xf32> to vector<1x8x16xf32>
    tpu.vector_store %arg4[%c0_113, %c0_114, %c128], %98 {strides = array<i32>} : memref<2x8x256xf32, #tpu.memory_space<vmem>>, vector<1x8x16xf32>,
    %c0_115 = arith.constant 0 : index
    %c162 = arith.constant 162 : index
    %99 = vector.load %arg6[%c0_115, %c162] : memref<8x576xf32, #tpu.memory_space<vmem>>, vector<8x16xf32>
    %c0_116 = arith.constant 0 : index
    %c0_117 = arith.constant 0 : index
    %c144_118 = arith.constant 144 : index
    %100 = vector.load %arg4[%c0_116, %c0_117, %c144_118] : memref<2x8x256xf32, #tpu.memory_space<vmem>>, vector<1x8x16xf32>
    %101 = vector.shape_cast %100 : vector<1x8x16xf32> to vector<8x16xf32>
    %102 = vector.shape_cast %99 : vector<8x16xf32> to vector<1x8x16xf32>
    tpu.vector_store %arg4[%c0_116, %c0_117, %c144_118], %102 {strides = array<i32>} : memref<2x8x256xf32, #tpu.memory_space<vmem>>, vector<1x8x16xf32>,
    %c0_119 = arith.constant 0 : index
    %c180 = arith.constant 180 : index
    %103 = vector.load %arg6[%c0_119, %c180] : memref<8x576xf32, #tpu.memory_space<vmem>>, vector<8x16xf32>
    %c0_120 = arith.constant 0 : index
    %c0_121 = arith.constant 0 : index
    %c160 = arith.constant 160 : index
    %104 = vector.load %arg4[%c0_120, %c0_121, %c160] : memref<2x8x256xf32, #tpu.memory_space<vmem>>, vector<1x8x16xf32>
    %105 = vector.shape_cast %104 : vector<1x8x16xf32> to vector<8x16xf32>
    %106 = vector.shape_cast %103 : vector<8x16xf32> to vector<1x8x16xf32>
    tpu.vector_store %arg4[%c0_120, %c0_121, %c160], %106 {strides = array<i32>} : memref<2x8x256xf32, #tpu.memory_space<vmem>>, vector<1x8x16xf32>,
    %c0_122 = arith.constant 0 : index
    %c198 = arith.constant 198 : index
    %107 = vector.load %arg6[%c0_122, %c198] : memref<8x576xf32, #tpu.memory_space<vmem>>, vector<8x16xf32>
    %c0_123 = arith.constant 0 : index
    %c0_124 = arith.constant 0 : index
    %c176 = arith.constant 176 : index
    %108 = vector.load %arg4[%c0_123, %c0_124, %c176] : memref<2x8x256xf32, #tpu.memory_space<vmem>>, vector<1x8x16xf32>
    %109 = vector.shape_cast %108 : vector<1x8x16xf32> to vector<8x16xf32>
    %110 = vector.shape_cast %107 : vector<8x16xf32> to vector<1x8x16xf32>
    tpu.vector_store %arg4[%c0_123, %c0_124, %c176], %110 {strides = array<i32>} : memref<2x8x256xf32, #tpu.memory_space<vmem>>, vector<1x8x16xf32>,
    %c0_125 = arith.constant 0 : index
    %c216 = arith.constant 216 : index
    %111 = vector.load %arg6[%c0_125, %c216] : memref<8x576xf32, #tpu.memory_space<vmem>>, vector<8x16xf32>
    %c0_126 = arith.constant 0 : index
    %c0_127 = arith.constant 0 : index
    %c192 = arith.constant 192 : index
    %112 = vector.load %arg4[%c0_126, %c0_127, %c192] : memref<2x8x256xf32, #tpu.memory_space<vmem>>, vector<1x8x16xf32>
    %113 = vector.shape_cast %112 : vector<1x8x16xf32> to vector<8x16xf32>
    %114 = vector.shape_cast %111 : vector<8x16xf32> to vector<1x8x16xf32>
    tpu.vector_store %arg4[%c0_126, %c0_127, %c192], %114 {strides = array<i32>} : memref<2x8x256xf32, #tpu.memory_space<vmem>>, vector<1x8x16xf32>,
    %c0_128 = arith.constant 0 : index
    %c234 = arith.constant 234 : index
    %115 = vector.load %arg6[%c0_128, %c234] : memref<8x576xf32, #tpu.memory_space<vmem>>, vector<8x16xf32>
    %c0_129 = arith.constant 0 : index
    %c0_130 = arith.constant 0 : index
    %c208 = arith.constant 208 : index
    %116 = vector.load %arg4[%c0_129, %c0_130, %c208] : memref<2x8x256xf32, #tpu.memory_space<vmem>>, vector<1x8x16xf32>
    %117 = vector.shape_cast %116 : vector<1x8x16xf32> to vector<8x16xf32>
    %118 = vector.shape_cast %115 : vector<8x16xf32> to vector<1x8x16xf32>
    tpu.vector_store %arg4[%c0_129, %c0_130, %c208], %118 {strides = array<i32>} : memref<2x8x256xf32, #tpu.memory_space<vmem>>, vector<1x8x16xf32>,
    %c0_131 = arith.constant 0 : index
    %c252 = arith.constant 252 : index
    %119 = vector.load %arg6[%c0_131, %c252] : memref<8x576xf32, #tpu.memory_space<vmem>>, vector<8x16xf32>
    %c0_132 = arith.constant 0 : index
    %c0_133 = arith.constant 0 : index
    %c224 = arith.constant 224 : index
    %120 = vector.load %arg4[%c0_132, %c0_133, %c224] : memref<2x8x256xf32, #tpu.memory_space<vmem>>, vector<1x8x16xf32>
    %121 = vector.shape_cast %120 : vector<1x8x16xf32> to vector<8x16xf32>
    %122 = vector.shape_cast %119 : vector<8x16xf32> to vector<1x8x16xf32>
    tpu.vector_store %arg4[%c0_132, %c0_133, %c224], %122 {strides = array<i32>} : memref<2x8x256xf32, #tpu.memory_space<vmem>>, vector<1x8x16xf32>,
    %c0_134 = arith.constant 0 : index
    %c270 = arith.constant 270 : index
    %123 = vector.load %arg6[%c0_134, %c270] : memref<8x576xf32, #tpu.memory_space<vmem>>, vector<8x16xf32>
    %c0_135 = arith.constant 0 : index
    %c0_136 = arith.constant 0 : index
    %c240 = arith.constant 240 : index
    %124 = vector.load %arg4[%c0_135, %c0_136, %c240] : memref<2x8x256xf32, #tpu.memory_space<vmem>>, vector<1x8x16xf32>
    %125 = vector.shape_cast %124 : vector<1x8x16xf32> to vector<8x16xf32>
    %126 = vector.shape_cast %123 : vector<8x16xf32> to vector<1x8x16xf32>
    tpu.vector_store %arg4[%c0_135, %c0_136, %c240], %126 {strides = array<i32>} : memref<2x8x256xf32, #tpu.memory_space<vmem>>, vector<1x8x16xf32>,
    %c0_137 = arith.constant 0 : index
    %c288_138 = arith.constant 288 : index
    %127 = vector.load %arg6[%c0_137, %c288_138] : memref<8x576xf32, #tpu.memory_space<vmem>>, vector<8x16xf32>
    %c1_139 = arith.constant 1 : index
    %c0_140 = arith.constant 0 : index
    %c0_141 = arith.constant 0 : index
    %128 = vector.load %arg4[%c1_139, %c0_140, %c0_141] : memref<2x8x256xf32, #tpu.memory_space<vmem>>, vector<1x8x16xf32>
    %129 = vector.shape_cast %128 : vector<1x8x16xf32> to vector<8x16xf32>
    %130 = vector.shape_cast %127 : vector<8x16xf32> to vector<1x8x16xf32>
    tpu.vector_store %arg4[%c1_139, %c0_140, %c0_141], %130 {strides = array<i32>} : memref<2x8x256xf32, #tpu.memory_space<vmem>>, vector<1x8x16xf32>,
    %c0_142 = arith.constant 0 : index
    %c306 = arith.constant 306 : index
    %131 = vector.load %arg6[%c0_142, %c306] : memref<8x576xf32, #tpu.memory_space<vmem>>, vector<8x16xf32>
    %c1_143 = arith.constant 1 : index
    %c0_144 = arith.constant 0 : index
    %c16_145 = arith.constant 16 : index
    %132 = vector.load %arg4[%c1_143, %c0_144, %c16_145] : memref<2x8x256xf32, #tpu.memory_space<vmem>>, vector<1x8x16xf32>
    %133 = vector.shape_cast %132 : vector<1x8x16xf32> to vector<8x16xf32>
    %134 = vector.shape_cast %131 : vector<8x16xf32> to vector<1x8x16xf32>
    tpu.vector_store %arg4[%c1_143, %c0_144, %c16_145], %134 {strides = array<i32>} : memref<2x8x256xf32, #tpu.memory_space<vmem>>, vector<1x8x16xf32>,
    %c0_146 = arith.constant 0 : index
    %c324 = arith.constant 324 : index
    %135 = vector.load %arg6[%c0_146, %c324] : memref<8x576xf32, #tpu.memory_space<vmem>>, vector<8x16xf32>
    %c1_147 = arith.constant 1 : index
    %c0_148 = arith.constant 0 : index
    %c32_149 = arith.constant 32 : index
    %136 = vector.load %arg4[%c1_147, %c0_148, %c32_149] : memref<2x8x256xf32, #tpu.memory_space<vmem>>, vector<1x8x16xf32>
    %137 = vector.shape_cast %136 : vector<1x8x16xf32> to vector<8x16xf32>
    %138 = vector.shape_cast %135 : vector<8x16xf32> to vector<1x8x16xf32>
    tpu.vector_store %arg4[%c1_147, %c0_148, %c32_149], %138 {strides = array<i32>} : memref<2x8x256xf32, #tpu.memory_space<vmem>>, vector<1x8x16xf32>,
    %c0_150 = arith.constant 0 : index
    %c342 = arith.constant 342 : index
    %139 = vector.load %arg6[%c0_150, %c342] : memref<8x576xf32, #tpu.memory_space<vmem>>, vector<8x16xf32>
    %c1_151 = arith.constant 1 : index
    %c0_152 = arith.constant 0 : index
    %c48_153 = arith.constant 48 : index
    %140 = vector.load %arg4[%c1_151, %c0_152, %c48_153] : memref<2x8x256xf32, #tpu.memory_space<vmem>>, vector<1x8x16xf32>
    %141 = vector.shape_cast %140 : vector<1x8x16xf32> to vector<8x16xf32>
    %142 = vector.shape_cast %139 : vector<8x16xf32> to vector<1x8x16xf32>
    tpu.vector_store %arg4[%c1_151, %c0_152, %c48_153], %142 {strides = array<i32>} : memref<2x8x256xf32, #tpu.memory_space<vmem>>, vector<1x8x16xf32>,
    %c0_154 = arith.constant 0 : index
    %c360 = arith.constant 360 : index
    %143 = vector.load %arg6[%c0_154, %c360] : memref<8x576xf32, #tpu.memory_space<vmem>>, vector<8x16xf32>
    %c1_155 = arith.constant 1 : index
    %c0_156 = arith.constant 0 : index
    %c64_157 = arith.constant 64 : index
    %144 = vector.load %arg4[%c1_155, %c0_156, %c64_157] : memref<2x8x256xf32, #tpu.memory_space<vmem>>, vector<1x8x16xf32>
    %145 = vector.shape_cast %144 : vector<1x8x16xf32> to vector<8x16xf32>
    %146 = vector.shape_cast %143 : vector<8x16xf32> to vector<1x8x16xf32>
    tpu.vector_store %arg4[%c1_155, %c0_156, %c64_157], %146 {strides = array<i32>} : memref<2x8x256xf32, #tpu.memory_space<vmem>>, vector<1x8x16xf32>,
    %c0_158 = arith.constant 0 : index
    %c378 = arith.constant 378 : index
    %147 = vector.load %arg6[%c0_158, %c378] : memref<8x576xf32, #tpu.memory_space<vmem>>, vector<8x16xf32>
    %c1_159 = arith.constant 1 : index
    %c0_160 = arith.constant 0 : index
    %c80_161 = arith.constant 80 : index
    %148 = vector.load %arg4[%c1_159, %c0_160, %c80_161] : memref<2x8x256xf32, #tpu.memory_space<vmem>>, vector<1x8x16xf32>
    %149 = vector.shape_cast %148 : vector<1x8x16xf32> to vector<8x16xf32>
    %150 = vector.shape_cast %147 : vector<8x16xf32> to vector<1x8x16xf32>
    tpu.vector_store %arg4[%c1_159, %c0_160, %c80_161], %150 {strides = array<i32>} : memref<2x8x256xf32, #tpu.memory_space<vmem>>, vector<1x8x16xf32>,
    %c0_162 = arith.constant 0 : index
    %c396 = arith.constant 396 : index
    %151 = vector.load %arg6[%c0_162, %c396] : memref<8x576xf32, #tpu.memory_space<vmem>>, vector<8x16xf32>
    %c1_163 = arith.constant 1 : index
    %c0_164 = arith.constant 0 : index
    %c96_165 = arith.constant 96 : index
    %152 = vector.load %arg4[%c1_163, %c0_164, %c96_165] : memref<2x8x256xf32, #tpu.memory_space<vmem>>, vector<1x8x16xf32>
    %153 = vector.shape_cast %152 : vector<1x8x16xf32> to vector<8x16xf32>
    %154 = vector.shape_cast %151 : vector<8x16xf32> to vector<1x8x16xf32>
    tpu.vector_store %arg4[%c1_163, %c0_164, %c96_165], %154 {strides = array<i32>} : memref<2x8x256xf32, #tpu.memory_space<vmem>>, vector<1x8x16xf32>,
    %c0_166 = arith.constant 0 : index
    %c414 = arith.constant 414 : index
    %155 = vector.load %arg6[%c0_166, %c414] : memref<8x576xf32, #tpu.memory_space<vmem>>, vector<8x16xf32>
    %c1_167 = arith.constant 1 : index
    %c0_168 = arith.constant 0 : index
    %c112_169 = arith.constant 112 : index
    %156 = vector.load %arg4[%c1_167, %c0_168, %c112_169] : memref<2x8x256xf32, #tpu.memory_space<vmem>>, vector<1x8x16xf32>
    %157 = vector.shape_cast %156 : vector<1x8x16xf32> to vector<8x16xf32>
    %158 = vector.shape_cast %155 : vector<8x16xf32> to vector<1x8x16xf32>
    tpu.vector_store %arg4[%c1_167, %c0_168, %c112_169], %158 {strides = array<i32>} : memref<2x8x256xf32, #tpu.memory_space<vmem>>, vector<1x8x16xf32>,
    %c0_170 = arith.constant 0 : index
    %c432 = arith.constant 432 : index
    %159 = vector.load %arg6[%c0_170, %c432] : memref<8x576xf32, #tpu.memory_space<vmem>>, vector<8x16xf32>
    %c1_171 = arith.constant 1 : index
    %c0_172 = arith.constant 0 : index
    %c128_173 = arith.constant 128 : index
    %160 = vector.load %arg4[%c1_171, %c0_172, %c128_173] : memref<2x8x256xf32, #tpu.memory_space<vmem>>, vector<1x8x16xf32>
    %161 = vector.shape_cast %160 : vector<1x8x16xf32> to vector<8x16xf32>
    %162 = vector.shape_cast %159 : vector<8x16xf32> to vector<1x8x16xf32>
    tpu.vector_store %arg4[%c1_171, %c0_172, %c128_173], %162 {strides = array<i32>} : memref<2x8x256xf32, #tpu.memory_space<vmem>>, vector<1x8x16xf32>,
    %c0_174 = arith.constant 0 : index
    %c450 = arith.constant 450 : index
    %163 = vector.load %arg6[%c0_174, %c450] : memref<8x576xf32, #tpu.memory_space<vmem>>, vector<8x16xf32>
    %c1_175 = arith.constant 1 : index
    %c0_176 = arith.constant 0 : index
    %c144_177 = arith.constant 144 : index
    %164 = vector.load %arg4[%c1_175, %c0_176, %c144_177] : memref<2x8x256xf32, #tpu.memory_space<vmem>>, vector<1x8x16xf32>
    %165 = vector.shape_cast %164 : vector<1x8x16xf32> to vector<8x16xf32>
    %166 = vector.shape_cast %163 : vector<8x16xf32> to vector<1x8x16xf32>
    tpu.vector_store %arg4[%c1_175, %c0_176, %c144_177], %166 {strides = array<i32>} : memref<2x8x256xf32, #tpu.memory_space<vmem>>, vector<1x8x16xf32>,
    %c0_178 = arith.constant 0 : index
    %c468 = arith.constant 468 : index
    %167 = vector.load %arg6[%c0_178, %c468] : memref<8x576xf32, #tpu.memory_space<vmem>>, vector<8x16xf32>
    %c1_179 = arith.constant 1 : index
    %c0_180 = arith.constant 0 : index
    %c160_181 = arith.constant 160 : index
    %168 = vector.load %arg4[%c1_179, %c0_180, %c160_181] : memref<2x8x256xf32, #tpu.memory_space<vmem>>, vector<1x8x16xf32>
    %169 = vector.shape_cast %168 : vector<1x8x16xf32> to vector<8x16xf32>
    %170 = vector.shape_cast %167 : vector<8x16xf32> to vector<1x8x16xf32>
    tpu.vector_store %arg4[%c1_179, %c0_180, %c160_181], %170 {strides = array<i32>} : memref<2x8x256xf32, #tpu.memory_space<vmem>>, vector<1x8x16xf32>,
    %c0_182 = arith.constant 0 : index
    %c486 = arith.constant 486 : index
    %171 = vector.load %arg6[%c0_182, %c486] : memref<8x576xf32, #tpu.memory_space<vmem>>, vector<8x16xf32>
    %c1_183 = arith.constant 1 : index
    %c0_184 = arith.constant 0 : index
    %c176_185 = arith.constant 176 : index
    %172 = vector.load %arg4[%c1_183, %c0_184, %c176_185] : memref<2x8x256xf32, #tpu.memory_space<vmem>>, vector<1x8x16xf32>
    %173 = vector.shape_cast %172 : vector<1x8x16xf32> to vector<8x16xf32>
    %174 = vector.shape_cast %171 : vector<8x16xf32> to vector<1x8x16xf32>
    tpu.vector_store %arg4[%c1_183, %c0_184, %c176_185], %174 {strides = array<i32>} : memref<2x8x256xf32, #tpu.memory_space<vmem>>, vector<1x8x16xf32>,
    %c0_186 = arith.constant 0 : index
    %c504 = arith.constant 504 : index
    %175 = vector.load %arg6[%c0_186, %c504] : memref<8x576xf32, #tpu.memory_space<vmem>>, vector<8x16xf32>
    %c1_187 = arith.constant 1 : index
    %c0_188 = arith.constant 0 : index
    %c192_189 = arith.constant 192 : index
    %176 = vector.load %arg4[%c1_187, %c0_188, %c192_189] : memref<2x8x256xf32, #tpu.memory_space<vmem>>, vector<1x8x16xf32>
    %177 = vector.shape_cast %176 : vector<1x8x16xf32> to vector<8x16xf32>
    %178 = vector.shape_cast %175 : vector<8x16xf32> to vector<1x8x16xf32>
    tpu.vector_store %arg4[%c1_187, %c0_188, %c192_189], %178 {strides = array<i32>} : memref<2x8x256xf32, #tpu.memory_space<vmem>>, vector<1x8x16xf32>,
    %c0_190 = arith.constant 0 : index
    %c522 = arith.constant 522 : index
    %179 = vector.load %arg6[%c0_190, %c522] : memref<8x576xf32, #tpu.memory_space<vmem>>, vector<8x16xf32>
    %c1_191 = arith.constant 1 : index
    %c0_192 = arith.constant 0 : index
    %c208_193 = arith.constant 208 : index
    %180 = vector.load %arg4[%c1_191, %c0_192, %c208_193] : memref<2x8x256xf32, #tpu.memory_space<vmem>>, vector<1x8x16xf32>
    %181 = vector.shape_cast %180 : vector<1x8x16xf32> to vector<8x16xf32>
    %182 = vector.shape_cast %179 : vector<8x16xf32> to vector<1x8x16xf32>
    tpu.vector_store %arg4[%c1_191, %c0_192, %c208_193], %182 {strides = array<i32>} : memref<2x8x256xf32, #tpu.memory_space<vmem>>, vector<1x8x16xf32>,
    %c0_194 = arith.constant 0 : index
    %c540 = arith.constant 540 : index
    %183 = vector.load %arg6[%c0_194, %c540] : memref<8x576xf32, #tpu.memory_space<vmem>>, vector<8x16xf32>
    %c1_195 = arith.constant 1 : index
    %c0_196 = arith.constant 0 : index
    %c224_197 = arith.constant 224 : index
    %184 = vector.load %arg4[%c1_195, %c0_196, %c224_197] : memref<2x8x256xf32, #tpu.memory_space<vmem>>, vector<1x8x16xf32>
    %185 = vector.shape_cast %184 : vector<1x8x16xf32> to vector<8x16xf32>
    %186 = vector.shape_cast %183 : vector<8x16xf32> to vector<1x8x16xf32>
    tpu.vector_store %arg4[%c1_195, %c0_196, %c224_197], %186 {strides = array<i32>} : memref<2x8x256xf32, #tpu.memory_space<vmem>>, vector<1x8x16xf32>,
    %c0_198 = arith.constant 0 : index
    %c558 = arith.constant 558 : index
    %187 = vector.load %arg6[%c0_198, %c558] : memref<8x576xf32, #tpu.memory_space<vmem>>, vector<8x16xf32>
    %c1_199 = arith.constant 1 : index
    %c0_200 = arith.constant 0 : index
    %c240_201 = arith.constant 240 : index
    %188 = vector.load %arg4[%c1_199, %c0_200, %c240_201] : memref<2x8x256xf32, #tpu.memory_space<vmem>>, vector<1x8x16xf32>
    %189 = vector.shape_cast %188 : vector<1x8x16xf32> to vector<8x16xf32>
    %190 = vector.shape_cast %187 : vector<8x16xf32> to vector<1x8x16xf32>
    tpu.vector_store %arg4[%c1_199, %c0_200, %c240_201], %190 {strides = array<i32>} : memref<2x8x256xf32, #tpu.memory_space<vmem>>, vector<1x8x16xf32>,
    return
  }
  func.func @transform_0(%arg0: i32) -> (i32, i32, i32) {
    %c0_i32 = arith.constant 0 : i32
    %c0_i32_0 = arith.constant 0 : i32
    %c0_i32_1 = arith.constant 0 : i32
    %c0_i32_2 = arith.constant 0 : i32
    return %c0_i32, %c0_i32_0, %c0_i32_1 : i32, i32, i32
  }
  func.func @transform_1(%arg0: i32) -> (i32, i32) {
    %c0_i32 = arith.constant 0 : i32
    %c0_i32_0 = arith.constant 0 : i32
    %c0_i32_1 = arith.constant 0 : i32
    return %c0_i32, %c0_i32_0 : i32, i32
  }
  func.func @transform_2(%arg0: i32) -> (i32, i32) {
    %c0_i32 = arith.constant 0 : i32
    %c0_i32_0 = arith.constant 0 : i32
    %c0_i32_1 = arith.constant 0 : i32
    return %c0_i32, %c0_i32_0 : i32, i32
  }
  func.func @transform_3(%arg0: i32) -> (i32, i32, i32) {
    %c0_i32 = arith.constant 0 : i32
    %c0_i32_0 = arith.constant 0 : i32
    %c0_i32_1 = arith.constant 0 : i32
    %c0_i32_2 = arith.constant 0 : i32
    return %c0_i32, %c0_i32_0, %c0_i32_1 : i32, i32, i32
  }
}

</mosaic_0001>

<bundles_post_ra>
// kernel: tpu_custom_call.1
= control target key start
LH: loop header
LB: loop body
LE: loop exit
PB: predicated region body
PF: predicated region fallthrough
CT: control target
= control target key end

     0   :  { %8 = vsyncpa [#allocation5], 0  ;;  %s1348_s0 = inlined_call_operand.hbm [shape: f32[2,4,342], index: 0, kind: input, shape index: {}]   ;;  %s1349_s1 = inlined_call_operand.vmem [shape: f32[8,36], index: 1, kind: input, shape index: {}]   ;;  %s1350_s2 = inlined_call_operand.vmem [shape: f32[8,1], index: 2, kind: input, shape index: {}]   ;;  %s1351_s3 = inlined_call_operand.hbm [shape: f32[2,8,256], index: 3, kind: output, shape index: {}]  }
   0x1   :  { %9 = vsyncpa [#allocation6], 0  ;;  %s1066_s12 = smov [#allocation4]   ;;  %s1018_s16 = scalar_lea.hbm %s1348_s0, 384 }
   0x2   :  { %s15_s13 = sshll.u32 %s1066_s12, 4  ;;  %p1019_p0 = scmp.ne.s32.totalorder %s1348_s0, %s1018_s16  ;;  %s16_s13 = int_to_ptr.vmem [resolvable:$true] %s15_s13 }
   0x3   :  { %p1022_p1 = scmp.lt.u32.totalorder %s1018_s16, %s1348_s0 }
   0x5   :  { %p1024_p2 = pnand %p1022_p1, %p1019_p0 }
   0x7   :  { %1027 = shalt.err (!%p1024_p2)
}
   0x8   :  { %s1028_s21 = scalar_lea.vmem %s16_s13, 384  ;;  %p1033_p4 = scmp.lt.s32.totalorder %s16_s13, %s16_s13 }
   0x9   :  { %p1029_p3 = scmp.ne.s32.totalorder %s16_s13, %s1028_s21  ;;  %p1034_p5 = scmp.lt.s32.totalorder %s1028_s21, %s1028_s21 }
   0xb   :  { %p1035_p6 = por %p1034_p5, %p1033_p4 }
   0xd   :  { %p1036_p7 = pnand %p1035_p6, %p1029_p3 }
   0xf   :  { %1039 = shalt.err (!%p1036_p7)
}
  0x10   :  { %s1067_s22 = smov 192   ;;  %s1068_s23 = smov 12  }
  0x11   :  { %21 = dma.hbm_to_vmem [thread:$0]  %s1348_s0, 384, %s16_s13, [#allocation5], %s1067_s22, %s1067_s22, %s1068_s23  }
  0x12   :  { %1062 = dma.done.wait [#allocation5], 384  }
  0x13   :  { %1063 = vsyncadd [#allocation5], 4294966912  ;;  %v107_v0 = vld [vmem:[#allocation4 + $0x8] sm:$0xf]  ;;  %v1149_v1 = vld [vmem:[#allocation4] sm:$0xff]  ;;  %s1069_s26 = smov 126  }
  0x14   :  { %115 = vrot.lane.b32.xlu1 %v107_v0, %s1069_s26  ;;  %s1070_s27 = smov 127   ;;  %v1155_v2 = vcombine.high %v1149_v1, %v1149_v1  ;;  %34 = vst [vmem:[#allocation2] sm:$0xf] %v1149_v1  ;;  %s1071_s0 = smov 110   ;;  %v1008_v3 = vld [vmem:[#allocation4 + $0x8] ss:$0 sps:$4 sm:$0xff]   ;;  %v65_v5 = vcombine.low %v1149_v1, %v1149_v1 }
  0x15   :  { %69 = vrot.lane.b32.xlu0 %v1149_v1, %s1070_s27  ;;  %v1009_v4 = vld [vmem:[#allocation4 + $0x8] ss:$0 sps:$4 sm:$0xff]   ;;  %s1072_s28 = smov 109   ;;  %s1073_s29 = smov 108   ;;  %vm36_vm0 = vcmask 257024   ;;  %v39_v11 = vld [vmem:[#allocation4 + $0xc] sm:$0xff] }
  0x16   :  { %35 = vst [vmem:[#allocation2 + $0x8] sm:$0xf] %v1155_v2  ;;  %v189_v6 = vld [vmem:[#allocation4 + $0x8] sm:$0xf]  ;;  %s1074_s30 = smov 92   ;;  %s1075_s4 = smov 91   ;;  %v43_v12 = vcombine.high %v39_v11, %v39_v11  ;;  %v87_v13 = vcombine.low %v39_v11, %v39_v11 }
  0x17   :  { %v1010_v7 = vld [vmem:[#allocation4 + $0x8] ss:$0 sps:$4 sm:$0xff]   ;;  %s1076_s5 = smov 32   ;;  %s1077_s6 = smov 31   ;;  %v291_v14 = vld [vmem:[#allocation4 + $0x14] sm:$0xf] }
  0x18   :  { %113 = vrot.lane.b32.xlu1 %v1155_v2, %s1069_s26  ;;  %v271_v8 = vld [vmem:[#allocation4 + $0x8] sm:$0xf]  ;;  %s1078_s7 = smov 30   ;;  %s1079_s8 = smov 14   ;;  %v1014_v15 = vld [vmem:[#allocation4 + $0x14] ss:$0 sps:$4 sm:$0xff]  }
  0x19   :  { %154 = vrot.lane.b32.xlu0 %v1149_v1, %s1071_s0  ;;  %v1011_v9 = vld [vmem:[#allocation4 + $0x8] ss:$0 sps:$4 sm:$0xff]   ;;  %s1080_s9 = smov 13   ;;  %s1081_s10 = smov 124   ;;  %v40_v16 = vld [vmem:[#allocation4 + $0x14] sm:$0xf] }
  0x1a   :  { %v30_v10 = vld [vmem:[#allocation4 + $0x8] sm:$0xf]  ;;  %s1082_s11 = smov 123   ;;  %s1083_s12 = smov 90   ;;  %v1015_v18 = vld [vmem:[#allocation4 + $0x14] ss:$0 sps:$4 sm:$0xff]  }
  0x1b   :  { %37 = vst.msk [vmem:[#allocation2 + $0x10] sm:$0xf] %vm36_vm0, %v30_v10  ;;  %v353_v17 = vld [vmem:[#allocation4 + $0x8] sm:$0xf]  ;;  %v127_v19 = vld [vmem:[#allocation4 + $0x14] sm:$0xf] }
  0x1c   :  { %156 = vrot.lane.b32.xlu1 %v1008_v3, %s1071_s0  ;;  %v1016_v20 = vld [vmem:[#allocation4 + $0x14] ss:$0 sps:$4 sm:$0xff]   ;;  %v1084_v21 = vmov 0.0   ;;  %s1085_s13 = smov 122   ;;  %v1086_v26 = vmov 0   ;;  %vm117_vm1 = vcmask 1031168  }
  0x1d   :  { %71 = vrot.lane.b32.xlu0 %v1009_v4, %s1070_s27  ;;  %508 = vmatprep.mubr.f32.mxu0 %v1084_v21  ;;  %v1017_v22 = vld [vmem:[#allocation4 + $0x14] ss:$0 sps:$4 sm:$0xff]   ;;  %vm81_vm2 = vcmask 261124   ;;  %vm158_vm3 = vcmask 900096   ;;  %vm73_vm4 = vcmask 1039360   ;;  %vm199_vm5 = vcmask 891904  }
  0x1e   :  { %579 = vmatprep.mubr.f32.mxu1 %v1084_v21  ;;  %v209_v23 = vld [vmem:[#allocation4 + $0x14] sm:$0xf]  ;;  %1004 = vset.pattern.permute.xlu1 %v1086_v26  ;;  %vm240_vm6 = vcmask 883712   ;;  %vm281_vm7 = vcmask 752640   ;;  %vm322_vm8 = vcmask 744448   ;;  %vm56_vm9 = vcmask 1043712  }
  0x1f   :  { %v373_v24 = vld [vmem:[#allocation4 + $0x14] sm:$0xf]  ;;  %1005 = vset.pattern.permute.xlu0 %v1086_v26  ;;  %vm101_vm10 = vcmask 1047812   ;;  %vm50_vm11 = vcmask 261120   ;;  %vm95_vm12 = vcmask 252928   ;;  %vm137_vm13 = vcmask 244736  }
  0x20   :  { %111 = vrot.lane.b32.xlu1 %v1149_v1, %s1069_s26  ;;  %v418_v25 = vld [vmem:[%s1350_s2] sm:$0xff]  ;;  %vm179_vm14 = vcmask 113664   ;;  %vm219_vm15 = vcmask 105472   ;;  %s1090_s17 = smov 94   ;;  %s1091_s18 = smov 86  }
  0x21   :  { %67 = vrot.lane.b32.xlu0 %v65_v5, %s1070_s27  ;;  %s1092_s19 = smov 118   ;;  %s1093_s20 = smov 114  }
  0x22   :  { %s1094_s21 = smov 120   ;;  %s1095_s22 = smov 98  }
  0x23   :  { %s1097_s24 = smov 112   ;;  %s1098_s25 = smov 100  }
  0x24   :  { %195 = vrot.lane.b32.xlu1 %v1155_v2, %s1072_s28  ;;  %s1100_s27 = smov 116  }
  0x25   :  { %152 = vrot.lane.b32.xlu0 %v65_v5, %s1071_s0 }
  0x28   :  { %236 = vrot.lane.b32.xlu1 %v1149_v1, %s1073_s29 }
  0x29   :  { %197 = vrot.lane.b32.xlu0 %v189_v6, %s1072_s28 }
  0x2c   :  { %277 = vrot.lane.b32.xlu1 %v1155_v2, %s1074_s30 }
  0x2d   :  { %238 = vrot.lane.b32.xlu0 %v1010_v7, %s1073_s29 }
  0x30   :  { %318 = vrot.lane.b32.xlu1 %v1149_v1, %s1075_s4 }
  0x31   :  { %279 = vrot.lane.b32.xlu0 %v271_v8, %s1074_s30 }
  0x34   :  { %193 = vrot.lane.b32.xlu1 %v1149_v1, %s1072_s28  ;;  %s1101_s28 = smov 76  }
  0x35   :  { %320 = vrot.lane.b32.xlu0 %v1011_v9, %s1075_s4 }
  0x38   :  { %275 = vrot.lane.b32.xlu1 %v1149_v1, %s1074_s30 }
  0x39   :  { %234 = vrot.lane.b32.xlu0 %v65_v5, %s1073_s29 }
  0x3c   :  { %44 = vrot.lane.b32.xlu1 %v39_v11, %s1076_s5 }
  0x3d   :  { %316 = vrot.lane.b32.xlu0 %v65_v5, %s1075_s4  ;;  %s1103_s4 = smov 106  }
  0x40   :  { %89 = vrot.lane.b32.xlu1 %v87_v13, %s1077_s6 }
  0x41   :  { %46 = vrot.lane.b32.xlu0 %v43_v12, %s1076_s5 }
  0x44   :  { %131 = vrot.lane.b32.xlu1 %v39_v11, %s1078_s7 }
  0x45   :  { %91 = vrot.lane.b32.xlu0 %v39_v11, %s1077_s6 }
  0x48   :  { %173 = vrot.lane.b32.xlu1 %v87_v13, %s1079_s8 }
  0x49   :  { %133 = vrot.lane.b32.xlu0 %v43_v12, %s1078_s7 }
  0x4c   :  { %213 = vrot.lane.b32.xlu1 %v39_v11, %s1080_s9 }
  0x4d   :  { %175 = vrot.lane.b32.xlu0 %v39_v11, %s1079_s8 }
  0x50   :  { %255 = vrot.lane.b32.xlu1 %v87_v13, %s1068_s23 }
  0x51   :  { %215 = vrot.lane.b32.xlu0 %v43_v12, %s1080_s9 }
  0x54   :  { %297 = vrot.lane.b32.xlu1 %v43_v12, %s1081_s10 }
  0x55   :  { %257 = vrot.lane.b32.xlu0 %v39_v11, %s1068_s23 }
  0x58   :  { %339 = vrot.lane.b32.xlu1 %v39_v11, %s1082_s11 }
  0x59   :  { %299 = vrot.lane.b32.xlu0 %v291_v14, %s1081_s10 }
  0x5c   :  { %359 = vrot.lane.b32.xlu1 %v1155_v2, %s1083_s12 }
  0x5d   :  { %341 = vrot.lane.b32.xlu0 %v1014_v15, %s1082_s11 }
  0x60   :  { %48 = vrot.lane.b32.xlu1 %v40_v16, %s1076_s5  ;;  %s1104_s5 = smov 72  }
  0x61   :  { %361 = vrot.lane.b32.xlu0 %v353_v17, %s1083_s12 }
  0x64   :  { %135 = vrot.lane.b32.xlu1 %v127_v19, %s1078_s7  ;;  %s1106_s7 = smov 104  }
  0x65   :  { %93 = vrot.lane.b32.xlu0 %v1015_v18, %s1077_s6  ;;  %s1105_s6 = smov 74  }
  0x68   :  { %295 = vrot.lane.b32.xlu1 %v39_v11, %s1081_s10 }
  0x69   :  { %177 = vrot.lane.b32.xlu0 %v1016_v20, %s1079_s8  ;;  %s1107_s8 = smov 102  }
  0x6c   :  { %357 = vrot.lane.b32.xlu1 %v1149_v1, %s1083_s12 }
  0x6d   :  { %337 = vrot.lane.b32.xlu0 %v87_v13, %s1082_s11  ;;  %s1112_s11 = smov 66  }
  0x70   :  { %259 = vrot.lane.b32.xlu1 %v1017_v22, %s1068_s23  ;;  %s1096_s23 = smov 88  }
  0x71   :  { %217 = vrot.lane.b32.xlu0 %v209_v23, %s1080_s9  ;;  %s1110_s9 = smov 82  }
  0x74   :  { %381 = vrot.lane.b32.xlu1 %v373_v24, %s1085_s13 }
  0x75   :  { %379 = vrot.lane.b32.xlu0 %v43_v12, %s1085_s13 }
  0x78   :  { %421 = vperm.xlu1 %1004, %v418_v25  }
  0x79   :  { %377 = vrot.lane.b32.xlu0 %v39_v11, %s1085_s13 }
  0x86   :  { %v116_v27 = vpop.permute.xlu1 %115 }
  0x87   :  { %v70_v28 = vpop.permute.xlu0 %69  ;;  %125 = vst.msk [vmem:[#allocation2 + $0x38] sm:$0xf] %vm36_vm0, %v116_v27 }
  0x8a   :  { %v114_v29 = vpop.permute.xlu1 %113 }
  0x8b   :  { %v155_v30 = vpop.permute.xlu0 %154  ;;  %v119_v31 = vsel %vm117_vm1, %v114_v29, %v116_v27 }
  0x8c   :  { %124 = vst [vmem:[#allocation2 + $0x30] sm:$0xf] %v119_v31 }
  0x8e   :  { %v157_v32 = vpop.permute.xlu1 %156 }
  0x8f   :  { %v72_v33 = vpop.permute.xlu0 %71  ;;  %v160_v34 = vsel %vm158_vm3, %v155_v30, %v157_v32  ;;  %166 = vst.msk [vmem:[#allocation2 + $0x38] sm:$0xf0] %vm81_vm2, %v157_v32 }
  0x90   :  { %v75_v35 = vsel %vm73_vm4, %v70_v28, %v72_v33  ;;  %82 = vst.msk [vmem:[#allocation2 + $0x10] sm:$0xf0] %vm81_vm2, %v72_v33  ;;  %165 = vst [vmem:[#allocation2 + $0x30] sm:$0xf0] %v160_v34 }
  0x91   :  { %80 = vst [vmem:[#allocation2 + $0x8] sm:$0xf0] %v75_v35 }
  0x92   :  { %v112_v36 = vpop.permute.xlu1 %111 }
  0x93   :  { %v68_v37 = vpop.permute.xlu0 %67  ;;  %v118_v38 = vsel %vm117_vm1, %v112_v36, %v114_v29  ;;  %vm261_vm1 = vcmask 97280  }
  0x94   :  { %v74_v39 = vsel %vm73_vm4, %v68_v37, %v70_v28  ;;  %123 = vst [vmem:[#allocation2 + $0x28] sm:$0xf] %v118_v38  ;;  %vm104_vm4 = vcmask 523268  }
  0x95   :  { %79 = vst [vmem:[#allocation2] sm:$0xf0] %v74_v39 }
  0x96   :  { %v196_v40 = vpop.permute.xlu1 %195 }
  0x97   :  { %v153_v41 = vpop.permute.xlu0 %152  ;;  %v399_v44 = vld [vmem:[#allocation2 + $0x30] sm:$0xff] }
  0x98   :  { %v159_v42 = vsel %vm158_vm3, %v153_v41, %v155_v30  ;;  %v394_v43 = vld [vmem:[#allocation2 + $0x8] sm:$0xff]  ;;  %vm301_vm3 = vcmask 1014784  }
  0x99   :  { %164 = vst [vmem:[#allocation2 + $0x28] sm:$0xf0] %v159_v42  ;;  %v932_v45 = vpack.c.bf16 %v399_v44, %v394_v43 }
  0x9a   :  { %v237_v46 = vpop.permute.xlu1 %236 }
  0x9b   :  { %v198_v47 = vpop.permute.xlu0 %197  ;;  %933 = vmatprep.subr.bf16.mxu0 %v932_v45 }
  0x9c   :  { %v201_v48 = vsel %vm199_vm5, %v196_v40, %v198_v47  ;;  %207 = vst.msk [vmem:[#allocation2 + $0x60] sm:$0xf] %vm36_vm0, %v198_v47  ;;  %v393_v52 = vld [vmem:[#allocation2] sm:$0xff] }
  0x9d   :  { %206 = vst [vmem:[#allocation2 + $0x58] sm:$0xf] %v201_v48 }
  0x9e   :  { %v278_v49 = vpop.permute.xlu1 %277 }
  0x9f   :  { %v239_v50 = vpop.permute.xlu0 %238 }
  0xa0   :  { %v242_v51 = vsel %vm240_vm6, %v237_v46, %v239_v50  ;;  %248 = vst.msk [vmem:[#allocation2 + $0x60] sm:$0xf0] %vm81_vm2, %v239_v50  ;;  %v398_v53 = vld [vmem:[#allocation2 + $0x28] sm:$0xff] }
  0xa1   :  { %247 = vst [vmem:[#allocation2 + $0x58] sm:$0xf0] %v242_v51  ;;  %v934_v54 = vpack.c.bf16 %v398_v53, %v393_v52 }
  0xa2   :  { %v319_v55 = vpop.permute.xlu1 %318 }
  0xa3   :  { %v280_v56 = vpop.permute.xlu0 %279  ;;  %935 = vmatpush1.bf16.msra.mxu0 %v934_v54 }
  0xa4   :  { %v283_v57 = vsel %vm281_vm7, %v278_v49, %v280_v56  ;;  %289 = vst.msk [vmem:[#allocation2 + $0x88] sm:$0xf] %vm36_vm0, %v280_v56 }
  0xa5   :  { %288 = vst [vmem:[#allocation2 + $0x80] sm:$0xf] %v283_v57 }
  0xa6   :  { %v194_v58 = vpop.permute.xlu1 %193 }
  0xa7   :  { %v321_v59 = vpop.permute.xlu0 %320  ;;  %v200_v60 = vsel %vm199_vm5, %v194_v58, %v196_v40  ;;  %vm343_vm5 = vcmask 1006592  }
  0xa8   :  { %v324_v61 = vsel %vm322_vm8, %v319_v55, %v321_v59  ;;  %330 = vst.msk [vmem:[#allocation2 + $0x88] sm:$0xf0] %vm81_vm2, %v321_v59  ;;  %205 = vst [vmem:[#allocation2 + $0x50] sm:$0xf] %v200_v60  ;;  %v404_v5 = vld [vmem:[#allocation2 + $0x58] sm:$0xff]  ;;  %vm59_vm2 = vcmask 519168  }
  0xa9   :  { %329 = vst [vmem:[#allocation2 + $0x80] sm:$0xf0] %v324_v61 }
  0xaa   :  { %v276_v62 = vpop.permute.xlu1 %275 }
  0xab   :  { %v235_v63 = vpop.permute.xlu0 %234  ;;  %v282_v0 = vsel %vm281_vm7, %v276_v62, %v278_v49  ;;  %vm428_vm7 = vcmask 1043456  }
  0xac   :  { %v241_v1 = vsel %vm240_vm6, %v235_v63, %v237_v46  ;;  %287 = vst [vmem:[#allocation2 + $0x78] sm:$0xf] %v282_v0  ;;  %vm363_vm6 = vcmask 736256  }
  0xad   :  { %246 = vst [vmem:[#allocation2 + $0x50] sm:$0xf0] %v241_v1 }
  0xae   :  { %v45_v3 = vpop.permute.xlu1 %44 }
  0xaf   :  { %v317_v2 = vpop.permute.xlu0 %316  ;;  %57 = vst.msk [vmem:[#allocation2 + $0x10] sm:$0xf] %vm56_vm9, %v45_v3 }
  0xb0   :  { %v323_v4 = vsel %vm322_vm8, %v317_v2, %v319_v55  ;;  %v409_v6 = vld [vmem:[#allocation2 + $0x80] sm:$0xff]  ;;  %vm424_vm8 = vcmask 293888  }
  0xb1   :  { %328 = vst [vmem:[#allocation2 + $0x78] sm:$0xf0] %v323_v4  ;;  %v936_v7 = vpack.c.bf16 %v409_v6, %v404_v5  ;;  %v392_v5 = vld [vmem:[%s1349_s1] sm:$0xff]  ;;  %s1089_s1 = smov 96  }
  0xb2   :  { %v90_v8 = vpop.permute.xlu1 %89 }
  0xb3   :  { %v1230_v9 = vpop.permute.xlu0 %46  ;;  %937 = vmatprep.subr.bf16.mxu0 %v936_v7  ;;  %102 = vst.msk [vmem:[#allocation2 + $0x10] sm:$0xf0] %vm101_vm10, %v90_v8 }
  0xb4   :  { %v51_v10 = vsel %vm50_vm11, %v45_v3, %v1230_v9  ;;  %v403_v14 = vld [vmem:[#allocation2 + $0x50] sm:$0xff] }
  0xb5   :  { %58 = vst [vmem:[#allocation2 + $0x18] sm:$0xf] %v51_v10 }
  0xb6   :  { %v132_v11 = vpop.permute.xlu1 %131 }
  0xb7   :  { %v1235_v12 = vpop.permute.xlu0 %91  ;;  %143 = vst.msk [vmem:[#allocation2 + $0x38] sm:$0xf] %vm56_vm9, %v132_v11 }
  0xb8   :  { %v96_v13 = vsel %vm95_vm12, %v90_v8, %v1235_v12  ;;  %v408_v15 = vld [vmem:[#allocation2 + $0x78] sm:$0xff] }
  0xb9   :  { %103 = vst [vmem:[#allocation2 + $0x18] sm:$0xf0] %v96_v13  ;;  %v938_v16 = vpack.c.bf16 %v408_v15, %v403_v14  ;;  %v1087_v13 = vmov 0.0|0.0  }
  0xba   :  { %v174_v17 = vpop.permute.xlu1 %173  ;;  %v395_v34 = vld [vmem:[#allocation2 + $0x10] sm:$0xff] }
  0xbb   :  { %v134_v18 = vpop.permute.xlu0 %133  ;;  %939 = vmatpush1.bf16.msra.mxu0 %v938_v16  ;;  %185 = vst.msk [vmem:[#allocation2 + $0x38] sm:$0xf0] %vm101_vm10, %v174_v17 }
  0xbc   :  { %v138_v19 = vsel %vm137_vm13, %v132_v11, %v134_v18 }
  0xbd   :  { %144 = vst [vmem:[#allocation2 + $0x40] sm:$0xf] %v138_v19 }
  0xbe   :  { %v214_v20 = vpop.permute.xlu1 %213 }
  0xbf   :  { %v176_v22 = vpop.permute.xlu0 %175  ;;  %225 = vst.msk [vmem:[#allocation2 + $0x60] sm:$0xf] %vm56_vm9, %v214_v20 }
  0xc0   :  { %v180_v23 = vsel %vm179_vm14, %v174_v17, %v176_v22  ;;  %v396_v31 = vld [vmem:[#allocation2 + $0x18] sm:$0xff] }
  0xc1   :  { %186 = vst [vmem:[#allocation2 + $0x40] sm:$0xf0] %v180_v23 }
  0xc2   :  { %v256_v24 = vpop.permute.xlu1 %255  ;;  %v400_v29 = vld [vmem:[#allocation2 + $0x38] sm:$0xff] }
  0xc3   :  { %v1244_v25 = vpop.permute.xlu0 %215  ;;  %267 = vst.msk [vmem:[#allocation2 + $0x60] sm:$0xf0] %vm101_vm10, %v256_v24  ;;  %v942_v35 = vpack.c.bf16 %v400_v29, %v395_v34 }
  0xc4   :  { %v220_v26 = vsel %vm219_vm15, %v214_v20, %v1244_v25 }
  0xc5   :  { %226 = vst [vmem:[#allocation2 + $0x68] sm:$0xf] %v220_v26 }
  0xc6   :  { %v298_v27 = vpop.permute.xlu1 %297 }
  0xc7   :  { %v258_v28 = vpop.permute.xlu0 %257 }
  0xc8   :  { %v262_v30 = vsel %vm261_vm1, %v256_v24, %v258_v28  ;;  %v401_v32 = vld [vmem:[#allocation2 + $0x40] sm:$0xff] }
  0xc9   :  { %268 = vst [vmem:[#allocation2 + $0x68] sm:$0xf0] %v262_v30  ;;  %v940_v33 = vpack.c.bf16 %v401_v32, %v396_v31 }
  0xca   :  { %v340_v36 = vpop.permute.xlu1 %339  ;;  %v405_v6 = vld [vmem:[#allocation2 + $0x60] sm:$0xff] }
  0xcb   :  { %941 = vmatprep.subr.bf16.mxu1 %v940_v33  ;;  %v300_v37 = vpop.permute.xlu0 %299 }
  0xcc   :  { %v303_v38 = vsel %vm301_vm3, %v298_v27, %v300_v37  ;;  %309 = vst.msk [vmem:[#allocation2 + $0x98] sm:$0xf] %vm59_vm2, %v300_v37  ;;  %943 = vmatpush1.bf16.msra.mxu1 %v942_v35 }
  0xcd   :  { %308 = vst [vmem:[#allocation2 + $0x90] sm:$0xf] %v303_v38 }
  0xce   :  { %v360_v39 = vpop.permute.xlu1 %359 }
  0xcf   :  { %v342_v40 = vpop.permute.xlu0 %341 }
  0xd0   :  { %v345_v41 = vsel %vm343_vm5, %v340_v36, %v342_v40  ;;  %351 = vst.msk [vmem:[#allocation2 + $0x98] sm:$0xf0] %vm104_vm4, %v342_v40  ;;  %v406_v50 = vld [vmem:[#allocation2 + $0x68] sm:$0xff] }
  0xd1   :  { %350 = vst [vmem:[#allocation2 + $0x90] sm:$0xf0] %v345_v41 }
  0xd2   :  { %v49_v42 = vpop.permute.xlu1 %48 }
  0xd3   :  { %v362_v43 = vpop.permute.xlu0 %361  ;;  %v52_v44 = vsel %vm50_vm11, %v1230_v9, %v49_v42  ;;  %vm665_vm11 = vcmask 523264  }
  0xd4   :  { %v365_v45 = vsel %vm363_vm6, %v360_v39, %v362_v43  ;;  %371 = vst.msk [vmem:[#allocation2 + $0xb0] sm:$0xf] %vm36_vm0, %v362_v43  ;;  %vm383_vm0 = vcmask 998400  }
  0xd5   :  { %60 = vst.msk [vmem:[#allocation2 + $0x20] sm:$0xf] %vm59_vm2, %v52_v44  ;;  %370 = vst [vmem:[#allocation2 + $0xa8] sm:$0xf] %v365_v45 }
  0xd6   :  { %v136_v46 = vpop.permute.xlu1 %135 }
  0xd7   :  { %v94_v47 = vpop.permute.xlu0 %93  ;;  %v139_v48 = vsel %vm137_vm13, %v134_v18, %v136_v46  ;;  %v412_v17 = vld [vmem:[#allocation2 + $0x98] sm:$0xff]  ;;  %vm682_vm13 = vcmask 392448  }
  0xd8   :  { %v97_v49 = vsel %vm95_vm12, %v1235_v12, %v94_v47  ;;  %v411_v51 = vld [vmem:[#allocation2 + $0x90] sm:$0xff]  ;;  %145 = vst.msk [vmem:[#allocation2 + $0x48] sm:$0xf] %vm59_vm2, %v139_v48  ;;  %vm675_vm12 = vcmask 261248  }
  0xd9   :  { %105 = vst.msk [vmem:[#allocation2 + $0x20] sm:$0xf0] %vm104_vm4, %v97_v49  ;;  %v944_v52 = vpack.c.bf16 %v411_v51, %v406_v50 }
  0xda   :  { %v296_v53 = vpop.permute.xlu1 %295 }
  0xdb   :  { %v178_v54 = vpop.permute.xlu0 %177  ;;  %945 = vmatprep.subr.bf16.mxu1 %v944_v52  ;;  %v302_v55 = vsel %vm301_vm3, %v296_v53, %v298_v27  ;;  %vm818_vm3 = vcmask 703488  }
  0xdc   :  { %v181_v56 = vsel %vm179_vm14, %v176_v22, %v178_v54  ;;  %v414_v57 = vld [vmem:[#allocation2 + $0xa8] sm:$0xf]  ;;  %307 = vst.msk [vmem:[#allocation2 + $0x88] sm:$0xf] %vm56_vm9, %v302_v55  ;;  %vm689_vm14 = vcmask 523648  }
  0xdd   :  { %187 = vst.msk [vmem:[#allocation2 + $0x48] sm:$0xf0] %vm104_vm4, %v181_v56  ;;  %905 = vmatprep.subr.msk.mxu0 %vm428_vm7, %v414_v57 }
  0xde   :  { %v358_v58 = vpop.permute.xlu1 %357 }
  0xdf   :  { %v338_v59 = vpop.permute.xlu0 %337  ;;  %v364_v60 = vsel %vm363_vm6, %v358_v58, %v360_v39  ;;  %vm720_vm6 = vcmask 932864  }
  0xe0   :  { %v344_v61 = vsel %vm343_vm5, %v338_v59, %v340_v36  ;;  %369 = vst [vmem:[#allocation2 + $0xa0] sm:$0xf] %v364_v60  ;;  %v397_v10 = vld [vmem:[#allocation2 + $0x20] sm:$0xff]  ;;  %vm723_vm5 = vcmask 1048448  }
  0xe1   :  { %349 = vst.msk [vmem:[#allocation2 + $0x88] sm:$0xf0] %vm101_vm10, %v344_v61  ;;  %vm1088_vm10 = vmmov 0  }
  0xe2   :  { %v260_v62 = vpop.permute.xlu1 %259 }
  0xe3   :  { %v218_v63 = vpop.permute.xlu0 %217  ;;  %v263_v0 = vsel %vm261_vm1, %v258_v28, %v260_v62  ;;  %vm703_vm1 = vcmask 786048  }
  0xe4   :  { %v221_v1 = vsel %vm219_vm15, %v1244_v25, %v218_v63  ;;  %269 = vst.msk [vmem:[#allocation2 + $0x70] sm:$0xf0] %vm104_vm4, %v263_v0  ;;  %v402_v2 = vld [vmem:[#allocation2 + $0x48] sm:$0xff]  ;;  %vm696_vm15 = vcmask 654848   ;;  %vm769_vm4 = vcmask 818176  }
  0xe5   :  { %227 = vst.msk [vmem:[#allocation2 + $0x70] sm:$0xf] %vm59_vm2, %v221_v1  ;;  %v949_v12 = vpack.c.bf16 %v402_v2, %v397_v10 }
  0xe6   :  { %v382_v3 = vpop.permute.xlu1 %381 }
  0xe7   :  { %v380_v4 = vpop.permute.xlu0 %379  ;;  %391 = vst.msk [vmem:[#allocation2 + $0xc0] sm:$0xf] %vm59_vm2, %v382_v3  ;;  %v413_v8 = vld [vmem:[#allocation2 + $0xa0] sm:$0xf]  ;;  %vm710_vm2 = vcmask 917248  }
  0xe8   :  { %v385_v7 = vsel %vm383_vm0, %v380_v4, %v382_v3  ;;  %v410_v9 = vld [vmem:[#allocation2 + $0x88] sm:$0xff]  ;;  %906 = vmatpush1.msk.msra.mxu0 %vm428_vm7, %v413_v8 }
  0xe9   :  { %390 = vst [vmem:[#allocation2 + $0xb8] sm:$0xf] %v385_v7  ;;  %v946_v11 = vpack.c.bf16 %v410_v9, %v405_v6  ;;  %948 = vmatprep.subr.bf16.mxu0 %v1087_v13  ;;  %907 = vmatmul.mubr.msk.f32.vlgmr.msra.gmra.mrb[0].mxu0 %vm424_vm8, %v392_v5 }
  0xea   :  { %950 = vmatpush3.bf16.msra.mxu0 %v949_v12  ;;  %929 = vmatprep.mubr.msk.f32.mxu0 %vm1088_vm10, %v1084_v21 }
  0xeb   :  { %v378_v14 = vpop.permute.xlu0 %377  ;;  %947 = vmatpush1.bf16.msra.mxu1 %v946_v11  ;;  %951 = vmatprep.subr.bf16.mxu0 %v1087_v13 }
  0xec   :  { %v384_v15 = vsel %vm383_vm0, %v378_v14, %v380_v4  ;;  %v407_v16 = vld [vmem:[#allocation2 + $0x70] sm:$0xff] }
  0xed   :  { %389 = vst.msk [vmem:[#allocation2 + $0xb0] sm:$0xf] %vm56_vm9, %v384_v15  ;;  %v952_v18 = vpack.c.bf16 %v412_v17, %v407_v16  ;;  %vm668_vm9 = vcmask 130048  }
  0xee   :  { %v417_v20 = vld [vmem:[#allocation2 + $0xc0] sm:$0xf] }
  0xef   :  { %953 = vmatpush3.bf16.msra.mxu0 %v952_v18 }
  0xf0   :  { %v416_v19 = vld [vmem:[#allocation2 + $0xb8] sm:$0xf]  ;;  %927 = vmatprep.subr.mxu0 %v1084_v21 }
  0xf1   :  { %908 = vmatprep.subr.msk.mxu1 %vm428_vm7, %v416_v19 }
  0xf3   :  { %928 = vmatpush3.msk.msra.mxu0 %vm428_vm7, %v417_v20 }
  0xf4   :  { %930 = vmatmul.mubr.msk.f32.vlgmr.msra.gmra.mrb[2].mxu0 %vm424_vm8, %v392_v5  ;;  %v415_v22 = vld [vmem:[#allocation2 + $0xb0] sm:$0xf] }
  0xf5   :  { %909 = vmatpush1.msk.msra.mxu1 %vm428_vm7, %v415_v22  ;;  %vm866_vm7 = vcmask 588800  }
  0xf6   :  { %910 = vmatmul.mubr.msk.f32.vlgmr.msra.gmra.mrb[0].mxu1 %vm424_vm8, %v392_v5 }
  0xf7   :  { %v422_v23 = vpop.permute.xlu1 %421 }
 0x1bc   :  { %v510_v24 = vpop.f32.mrb[0].mxu0 }
 0x1bd   :  { %v511_v25 = vadd.f32 %v510_v24, %v422_v23  ;;  %v512_v26 = vpop.f32.mrb[1].mxu0 }
 0x1be   :  { %v513_v27 = vadd.f32 %v512_v26, %v422_v23 }
 0x1bf   :  { %v656_v28 = vmax.f32 %v511_v25, 0.0 }
 0x1c0   :  { %v657_v21 = vmax.f32 %v513_v27, 0.0 }
 0x1c1   :  { %672 = vrot.lane.b32.xlu0 %v656_v28, %s1069_s26  ;;  %679 = vrot.lane.b32.xlu1 %v656_v28, %s1081_s10  ;;  %669 = vst.msk [vmem:[#allocation7] sm:$0xff] %vm668_vm9, %v656_v28  ;;  %s1099_s26 = smov 80   ;;  %s1111_s10 = smov 70  }
 0x1c7   :  { %v652_v29 = vpop.f32.mrb[2].mxu0 }
 0x1c8   :  { %v653_v30 = vadd.f32 %v652_v29, %v422_v23  ;;  %v931_v31 = vpop.f32.mrb[3].mxu0 }
 0x1c9   :  { %v581_v32 = vpop.f32.mrb[0].mxu1 }
 0x1ca   :  { %v660_v33 = vmax.f32 %v653_v30, 0.0  ;;  %v582_v34 = vadd.f32 %v581_v32, %v422_v23  ;;  %v583_v35 = vpop.f32.mrb[1].mxu1 }
 0x1cb   :  { %v584_v36 = vadd.f32 %v583_v35, %v422_v23 }
 0x1cc   :  { %666 = vst.msk [vmem:[#allocation3 + $0x20] sm:$0xff] %vm665_vm11, %v660_v33  ;;  %v658_v37 = vmax.f32 %v582_v34, 0.0 }
 0x1cd   :  { %v659_v38 = vmax.f32 %v584_v36, 0.0 }
 0x1ce   :  { %781 = vrot.lane.b32.xlu1 %v658_v37, %s1089_s1  ;;  %788 = vrot.lane.b32.xlu0 %v658_v37, %s1090_s17 }
 0x1d2   :  { %794 = vrot.lane.b32.xlu1 %v658_v37, %s1074_s30  ;;  %814 = vrot.lane.b32.xlu0 %v658_v37, %s1091_s18  ;;  %s1102_s30 = smov 78  }
 0x1d3   :  { %v876_v39 = vld [vmem:[#allocation3 + $0x20] sm:$0xff] }
 0x1d6   :  { %686 = vrot.lane.b32.xlu1 %v656_v28, %s1085_s13  ;;  %700 = vrot.lane.b32.xlu0 %v656_v28, %s1092_s19 }
 0x1da   :  { %800 = vrot.lane.b32.xlu1 %v658_v37, %s1083_s12  ;;  %716 = vrot.lane.b32.xlu0 %v656_v28, %s1093_s20  ;;  %s1113_s12 = smov [#allocation7]  }
 0x1db   :  { %s893_s13 = sshll.u32 %s1113_s12, 4  ;;  %s894_s13 = int_to_ptr.vmem [resolvable:$true] %s893_s13 }
 0x1dc   :  { %s1040_s14 = scalar_lea.vmem %s894_s13, 512  ;;  %p1045_p9 = scmp.lt.s32.totalorder %s894_s13, %s894_s13 }
 0x1dd   :  { %p1041_p8 = scmp.ne.s32.totalorder %s894_s13, %s1040_s14  ;;  %p1046_p10 = scmp.lt.s32.totalorder %s1040_s14, %s1040_s14 }
 0x1de   :  { %693 = vrot.lane.b32.xlu1 %v656_v28, %s1094_s21  ;;  %775 = vrot.lane.b32.xlu0 %v658_v37, %s1095_s22 }
 0x1df   :  { %p1047_p11 = por %p1046_p10, %p1045_p9 }
 0x1e1   :  { %p1048_p12 = pnand %p1047_p11, %p1041_p8 }
 0x1e2   :  { %806 = vrot.lane.b32.xlu1 %v658_v37, %s1096_s23  ;;  %727 = vrot.lane.b32.xlu0 %v657_v21, %s1097_s24 }
 0x1e6   :  { %767 = vrot.lane.b32.xlu1 %v658_v37, %s1098_s25  ;;  %836 = vrot.lane.b32.xlu0 %v659_v38, %s1099_s26 }
 0x1ea   :  { %707 = vrot.lane.b32.xlu1 %v656_v28, %s1100_s27  ;;  %739 = vrot.lane.b32.xlu0 %v657_v21, %s1073_s29  ;;  %s1109_s29 = smov 68  }
 0x1ee   :  { %733 = vrot.lane.b32.xlu1 %v657_v21, %s1071_s0  ;;  %848 = vrot.lane.b32.xlu0 %v659_v38, %s1101_s28  ;;  %s1108_s0 = smov 84  }
 0x1f2   :  { %842 = vrot.lane.b32.xlu1 %v659_v38, %s1102_s30  ;;  %745 = vrot.lane.b32.xlu0 %v657_v21, %s1103_s4 }
 0x1f6   :  { %862 = vrot.lane.b32.xlu1 %v659_v38, %s1104_s5  ;;  %854 = vrot.lane.b32.xlu0 %v659_v38, %s1105_s6 }
 0x1fa   :  { %816 = vrot.lane.b32.xlu1 %v659_v38, %s1091_s18  ;;  %751 = vrot.lane.b32.xlu0 %v657_v21, %s1106_s7 }
 0x1fe   :  { %757 = vrot.lane.b32.xlu1 %v657_v21, %s1107_s8  ;;  %765 = vrot.lane.b32.xlu0 %v657_v21, %s1098_s25 }
 0x202   :  { %718 = vrot.lane.b32.xlu1 %v657_v21, %s1093_s20  ;;  %824 = vrot.lane.b32.xlu0 %v659_v38, %s1108_s0 }
 0x206   :  { %878 = vrot.lane.b32.xlu1 %v876_v39, %s1109_s29  ;;  %864 = vrot.lane.b32.xlu0 %v876_v39, %s1104_s5 }
 0x20a   :  { %830 = vrot.lane.b32.xlu1 %v659_v38, %s1110_s9  ;;  %872 = vrot.lane.b32.xlu0 %v876_v39, %s1111_s10 }
 0x20e   :  { %884 = vrot.lane.b32.xlu0 %v876_v39, %s1112_s11 }
 0x233   :  { %v673_v40 = vpop.permute.xlu0 %672  ;;  %v680_v41 = vpop.permute.xlu1 %679 }
 0x234   :  { %676 = vst.msk [vmem:[#allocation7] sm:$0xff] %vm675_vm12, %v673_v40 }
 0x235   :  { %683 = vst.msk [vmem:[#allocation7] sm:$0xff] %vm682_vm13, %v680_v41 }
 0x240   :  { %v782_v42 = vpop.permute.xlu1 %781  ;;  %v789_v43 = vpop.permute.xlu0 %788 }
 0x241   :  { %785 = vst.msk [vmem:[#allocation7 + $0x10] sm:$0xff] %vm668_vm9, %v782_v42 }
 0x242   :  { %791 = vst.msk [vmem:[#allocation7 + $0x10] sm:$0xff] %vm675_vm12, %v789_v43 }
 0x244   :  { %v795_v44 = vpop.permute.xlu1 %794  ;;  %v815_v45 = vpop.permute.xlu0 %814 }
 0x245   :  { %797 = vst.msk [vmem:[#allocation7 + $0x10] sm:$0xff] %vm682_vm13, %v795_v44 }
 0x248   :  { %v687_v46 = vpop.permute.xlu1 %686  ;;  %v701_v47 = vpop.permute.xlu0 %700 }
 0x249   :  { %690 = vst.msk [vmem:[#allocation7] sm:$0xff] %vm689_vm14, %v687_v46 }
 0x24c   :  { %v801_v48 = vpop.permute.xlu1 %800  ;;  %v717_v49 = vpop.permute.xlu0 %716 }
 0x24d   :  { %803 = vst.msk [vmem:[#allocation7 + $0x10] sm:$0xff] %vm689_vm14, %v801_v48 }
 0x250   :  { %v694_v50 = vpop.permute.xlu1 %693  ;;  %v776_v51 = vpop.permute.xlu0 %775 }
 0x251   :  { %697 = vst.msk [vmem:[#allocation7] sm:$0xff] %vm696_vm15, %v694_v50 }
 0x252   :  { %704 = vst.msk [vmem:[#allocation7] sm:$0xff] %vm703_vm1, %v701_v47 }
 0x254   :  { %v807_v52 = vpop.permute.xlu1 %806  ;;  %v728_v53 = vpop.permute.xlu0 %727 }
 0x255   :  { %809 = vst.msk [vmem:[#allocation7 + $0x10] sm:$0xff] %vm696_vm15, %v807_v52 }
 0x256   :  { %730 = vst.msk [vmem:[#allocation7 + $0x8] sm:$0xff] %vm668_vm9, %v728_v53 }
 0x258   :  { %v768_v54 = vpop.permute.xlu1 %767  ;;  %v837_v55 = vpop.permute.xlu0 %836 }
 0x259   :  { %839 = vst.msk [vmem:[#allocation7 + $0x18] sm:$0xff] %vm668_vm9, %v837_v55 }
 0x25c   :  { %v708_v56 = vpop.permute.xlu1 %707  ;;  %v740_v57 = vpop.permute.xlu0 %739 }
 0x25d   :  { %711 = vst.msk [vmem:[#allocation7] sm:$0xff] %vm710_vm2, %v708_v56 }
 0x260   :  { %v734_v58 = vpop.permute.xlu1 %733  ;;  %v849_v59 = vpop.permute.xlu0 %848 }
 0x261   :  { %736 = vst.msk [vmem:[#allocation7 + $0x8] sm:$0xff] %vm675_vm12, %v734_v58 }
 0x262   :  { %742 = vst.msk [vmem:[#allocation7 + $0x8] sm:$0xff] %vm682_vm13, %v740_v57 }
 0x264   :  { %v843_v60 = vpop.permute.xlu1 %842  ;;  %v746_v61 = vpop.permute.xlu0 %745 }
 0x265   :  { %845 = vst.msk [vmem:[#allocation7 + $0x18] sm:$0xff] %vm675_vm12, %v843_v60 }
 0x266   :  { %748 = vst.msk [vmem:[#allocation7 + $0x8] sm:$0xff] %vm689_vm14, %v746_v61 }
 0x267   :  { %851 = vst.msk [vmem:[#allocation7 + $0x18] sm:$0xff] %vm682_vm13, %v849_v59 }
 0x268   :  { %v863_v62 = vpop.permute.xlu1 %862  ;;  %v855_v63 = vpop.permute.xlu0 %854 }
 0x269   :  { %857 = vst.msk [vmem:[#allocation7 + $0x18] sm:$0xff] %vm689_vm14, %v855_v63 }
 0x26c   :  { %v817_v0 = vpop.permute.xlu1 %816  ;;  %v752_v1 = vpop.permute.xlu0 %751 }
 0x26d   :  { %v819_v2 = vsel %vm818_vm3, %v815_v45, %v817_v0  ;;  %754 = vst.msk [vmem:[#allocation7 + $0x8] sm:$0xff] %vm696_vm15, %v752_v1 }
 0x26e   :  { %821 = vst.msk [vmem:[#allocation7 + $0x10] sm:$0xff] %vm703_vm1, %v819_v2 }
 0x270   :  { %v758_v3 = vpop.permute.xlu1 %757  ;;  %v766_v4 = vpop.permute.xlu0 %765 }
 0x271   :  { %760 = vst.msk [vmem:[#allocation7 + $0x8] sm:$0xff] %vm703_vm1, %v758_v3  ;;  %v770_v5 = vsel %vm769_vm4, %v766_v4, %v768_v54 }
 0x272   :  { %772 = vst.msk [vmem:[#allocation7 + $0x8] sm:$0xff] %vm710_vm2, %v770_v5 }
 0x273   :  { %778 = vst.msk [vmem:[#allocation7 + $0x8] sm:$0xff] %vm723_vm5, %v776_v51 }
 0x274   :  { %v719_v6 = vpop.permute.xlu1 %718  ;;  %v825_v7 = vpop.permute.xlu0 %824 }
 0x275   :  { %v721_v8 = vsel %vm720_vm6, %v717_v49, %v719_v6  ;;  %827 = vst.msk [vmem:[#allocation7 + $0x10] sm:$0xff] %vm710_vm2, %v825_v7 }
 0x276   :  { %724 = vst.msk [vmem:[#allocation7] sm:$0xff] %vm723_vm5, %v721_v8 }
 0x278   :  { %v879_v9 = vpop.permute.xlu1 %878  ;;  %v865_v10 = vpop.permute.xlu0 %864 }
 0x279   :  { %v867_v11 = vsel %vm866_vm7, %v863_v62, %v865_v10 }
 0x27a   :  { %869 = vst.msk [vmem:[#allocation7 + $0x18] sm:$0xff] %vm696_vm15, %v867_v11 }
 0x27c   :  { %v831_v12 = vpop.permute.xlu1 %830  ;;  %v873_v13 = vpop.permute.xlu0 %872 }
 0x27d   :  { %833 = vst.msk [vmem:[#allocation7 + $0x10] sm:$0xff] %vm723_vm5, %v831_v12 }
 0x27e   :  { %875 = vst.msk [vmem:[#allocation7 + $0x18] sm:$0xff] %vm703_vm1, %v873_v13 }
 0x27f   :  { %881 = vst.msk [vmem:[#allocation7 + $0x18] sm:$0xff] %vm710_vm2, %v879_v9 }
 0x280   :  { %v885_v14 = vpop.permute.xlu0 %884 }
 0x281   :  { %887 = vst.msk [vmem:[#allocation7 + $0x18] sm:$0xff] %vm723_vm5, %v885_v14 }
 0x282   :  { %1051 = shalt.err (!%p1048_p12)
}
 0x283   :  { %s1052_s16 = scalar_lea.hbm %s1351_s3, 512 }
 0x284   :  { %p1053_p13 = scmp.ne.s32.totalorder %s1351_s3, %s1052_s16  ;;  %p1056_p0 = scmp.lt.u32.totalorder %s1052_s16, %s1351_s3 }
 0x286   :  { %p1058_p1 = pnand %p1056_p0, %p1053_p13 }
 0x288   :  { %1061 = shalt.err (!%p1058_p1)
}
 0x289   :  { %s1114_s20 = smov 256   ;;  %s1115_s21 = smov 16  }
 0x28a   :  { %899 = dma.vmem_to_hbm [thread:$0]  %s894_s13, 512, %s1351_s3, [#allocation6], %s1114_s20, %s1114_s20, %s1115_s21  }
 0x28b   :  { %1064 = dma.done.wait [#allocation6], 512  }
 0x28c   :  { %1065 = vsyncadd [#allocation6], 4294966784 }
 0x28d   :  { %903 = vsyncpa [#allocation5], 1 }
 0x28e   :  { %904 = vsyncpa [#allocation6], 1 }

</bundles_post_ra>
